<compile_context>
chip_gen: v5e
topology: v5e:2x2
jax: 0.10.0
libtpu: 0.0.40
codegen_flags: <defaults>
</compile_context>

<pallas_src>
import jax
import jax.numpy as jnp
from jax import lax
from jax.experimental import pallas as pl
from jax.experimental.pallas import tpu as pltpu
import numpy as np


# ------------------------------- Pallas kernel -------------------------------

def _fused_net_kernel(x_ref, w1_ref, b1_ref, s1_ref, w2_ref, b2_ref, s2_ref,
                      v1_ref, fb1_ref, w3_ref, fb2_ref, o_ref, feat_ref):
    """One batch tile: per-image conv/pool stages, then batched FC head."""
    bt = x_ref.shape[0]

    # ---- per-image conv / pool stages (feature maps kept as 2-D (H, W*C)) ----
    @pl.loop(0, bt)
    def _(b):
        x = x_ref[b]                                               # (28, 28)

        # conv1 as a single wide-K banded matmul (K = 5*28 = 140) + bias.
        lhs1 = jnp.concatenate([x[i:i + 24, :] for i in range(5)], axis=1)
        y1 = jnp.dot(lhs1, w1_ref[...],
                     preferred_element_type=jnp.float32) + b1_ref[...]   # (24, 240)

        # 2x2 max-pool + relu.  Rows: shifted max + ONE even-row selection
        # matmul.  Columns: shifted max, kept lane-wide (compaction folded
        # into the zero-padded conv2 weights).
        rm1 = jnp.maximum(y1[:-1, :], y1[1:, :])                   # (23, 240)
        r1 = jnp.dot(s1_ref[...], rm1,
                     preferred_element_type=jnp.float32)           # (12, 240)
        z1 = jnp.maximum(jnp.maximum(r1[:, :230], r1[:, 10:]), 0.0)   # (12, 230)

        # conv2 as a single wide-K banded matmul (K = 5*230 = 1150) + bias.
        # TODO(synk): Dropout2d in training mode not implemented (eval => identity).
        lhs2 = jnp.concatenate([z1[i:i + 8, :] for i in range(5)], axis=1)
        y2 = jnp.dot(lhs2, w2_ref[...],
                     preferred_element_type=jnp.float32) + b2_ref[...]   # (8, 160)

        rm2 = jnp.maximum(y2[:-1, :], y2[1:, :])                   # (7, 160)
        r2 = jnp.dot(s2_ref[...], rm2,
                     preferred_element_type=jnp.float32)           # (4, 160)
        z2 = jnp.maximum(jnp.maximum(r2[:, :140], r2[:, 20:]), 0.0)   # (4, 140)

        # Deposit this image's (lane-wide) flattened features for the batched FC.
        feat = jnp.concatenate([z2[r:r + 1, :] for r in range(4)], axis=1)  # (1, 560)
        feat_ref[pl.ds(b, 1), :] = feat

    # ---- batched fully-connected head (M = bt matmuls) + log_softmax ----
    h = jnp.dot(feat_ref[...], v1_ref[...],
                preferred_element_type=jnp.float32) + fb1_ref[...]        # (bt, 50)
    h = jnp.maximum(h, 0.0)
    # TODO(synk): F.dropout in training mode not implemented (eval => identity).
    logits = jnp.dot(h, w3_ref[...],
                     preferred_element_type=jnp.float32) + fb2_ref[...]   # (bt, 10)
    m = jnp.max(logits, axis=-1, keepdims=True)
    lse = m + jnp.log(jnp.sum(jnp.exp(logits - m), axis=-1, keepdims=True))
    o_ref[...] = logits - lse


# ---------------------------- weight pre-packing ------------------------------

def _banded_weights(conv_w, w_in):
    """(Cout, Cin, KH, KW) -> (KH, W_in*Cin, W_out*Cout) banded matmul weights.

    Rows ordered (w, cin), cols ordered (w_out, cout); W_out = W_in - KW + 1.
    """
    cout, cin, kh, kw = conv_w.shape
    w_out = w_in - kw + 1
    w_idx = jnp.arange(w_in)
    p_idx = jnp.arange(w_out)
    j_idx = jnp.arange(kw)
    band = (w_idx[None, None, :] ==
            p_idx[None, :, None] + j_idx[:, None, None]).astype(jnp.float32)
    w = jnp.einsum("jpw,ocij->iwcpo", band, conv_w.astype(jnp.float32))
    return w.reshape(kh, w_in * cin, w_out * cout)


def _pack_conv1(conv1_w):
    """Merged conv1 band weights: (5*28, 240) for the wide-K LHS."""
    return _banded_weights(conv1_w, w_in=28).reshape(5 * 28, 240)


def _pack_conv2_lanewide(conv2_w):
    """Merged conv2 band weights consuming the LANE-WIDE (230-col) z1 layout.

    z1 lane 20*q + c holds the pooled value (col q, channel c); lanes
    20*q + 10 + c hold garbage and get zero weight rows (column compaction
    folded into the weights).  Result: (5*230, 160) = (1150, 160).
    """
    wb = _banded_weights(conv2_w, w_in=12)              # (5, 120, 160), rows q*10+c
    wb = wb.reshape(5, 12, 10, 160)
    wb = jnp.concatenate([wb, jnp.zeros((5, 12, 10, 160), jnp.float32)], axis=2)
    wb = wb.reshape(5, 240, 160)[:, :230, :]            # z1 is 230 lanes wide
    return wb.reshape(5 * 230, 160)


def _pack_fc1_lanewide(fc1_w):
    """fc1 weights consuming the per-image lane-wide feature row (1, 560).

    Feature lane 140*r + 40*s + c holds pooled value (channel c, row r, col s);
    PyTorch's x.view(-1, 320) flattens in (c, h, w) order.  Garbage lanes
    (140*r + 40*s + 20..39) get zero rows.  Result: (560, 50).
    """
    w = fc1_w.astype(jnp.float32).reshape(50, 20, 4, 4)   # (o, c, r, s)
    v = jnp.transpose(w, (2, 3, 1, 0))                    # (r, s, c, o)
    v = jnp.concatenate([v, jnp.zeros((4, 4, 20, 50), jnp.float32)], axis=2)
    v = v.reshape(4, 160, 50)[:, :140, :]                 # z2 has 140 lanes
    return v.reshape(560, 50)


def _even_row_selector(n_out, n_in):
    """(n_out, n_in) 0/1 matrix selecting rows 0, 2, 4, ... from the row-max."""
    s = np.zeros((n_out, n_in), np.float32)
    s[np.arange(n_out), 2 * np.arange(n_out)] = 1.0
    return jnp.asarray(s)


def _full_spec(a):
    nd = a.ndim
    return pl.BlockSpec(a.shape, lambda i: (0,) * nd)


def _pick_bt(n):
    """Batch-tile size: multiple of 8, capped at 128, ~2+ grid steps when possible."""
    half = -(-n // 2)                       # ceil(n / 2)
    return min(128, max(8, ((half + 7) // 8) * 8))


# ----------------------------------- forward ----------------------------------

def net_forward(x_nchw, params):
    """Inference-mode forward pass (dropout layers are identity)."""
    (conv1_w, conv1_b, conv2_w, conv2_b,
     fc1_w, fc1_b, fc2_w, fc2_b) = params
    n = x_nchw.shape[0]

    x = x_nchw.reshape(n, 28, 28).astype(jnp.float32)
    bt = _pick_bt(n)
    n_pad = ((n + bt - 1) // bt) * bt
    if n_pad != n:
        x = jnp.pad(x, ((0, n_pad - n), (0, 0), (0, 0)))

    # Pre-packed weights (tiny, weight-only work at the XLA level).
    w1m = _pack_conv1(conv1_w)                                     # (140, 240)
    b1 = jnp.tile(conv1_b.astype(jnp.float32), 24).reshape(1, 240)
    w2m = _pack_conv2_lanewide(conv2_w)                            # (1150, 160)
    b2 = jnp.tile(conv2_b.astype(jnp.float32), 8).reshape(1, 160)
    s1 = _even_row_selector(12, 23)
    s2 = _even_row_selector(4, 7)
    v1 = _pack_fc1_lanewide(fc1_w)                                 # (560, 50)
    fb1 = fc1_b.reshape(1, 50).astype(jnp.float32)
    w3 = fc2_w.T.astype(jnp.float32)                               # (50, 10)
    fb2 = fc2_b.reshape(1, 10).astype(jnp.float32)

    operands = (x, w1m, b1, s1, w2m, b2, s2, v1, fb1, w3, fb2)
    in_specs = [pl.BlockSpec((bt, 28, 28), lambda i: (i, 0, 0))]
    in_specs += [_full_spec(a) for a in operands[1:]]

    out = pl.pallas_call(
        _fused_net_kernel,
        out_shape=jax.ShapeDtypeStruct((n_pad, 10), jnp.float32),
        grid=(n_pad // bt,),
        in_specs=in_specs,
        out_specs=pl.BlockSpec((bt, 10), lambda i: (i, 0)),
        scratch_shapes=[pltpu.VMEM((bt, 560), jnp.float32)],
        compiler_params=pltpu.CompilerParams(
            dimension_semantics=("parallel",)),
    )(*operands)
    return out[:n]


# ------------------------------ pure-JAX reference ----------------------------

def reference_forward(x_nchw, params):
    (conv1_w, conv1_b, conv2_w, conv2_b,
     fc1_w, fc1_b, fc2_w, fc2_b) = params
    dn = ("NCHW", "OIHW", "NCHW")
    y = lax.conv_general_dilated(x_nchw, conv1_w, (1, 1), "VALID",
                                 dimension_numbers=dn)
    y = y + conv1_b[None, :, None, None]
    y = lax.reduce_window(y, -jnp.inf, lax.max, (1, 1, 2, 2), (1, 1, 2, 2),
                          "VALID")
    y = jnp.maximum(y, 0.0)
    y = lax.conv_general_dilated(y, conv2_w, (1, 1), "VALID",
                                 dimension_numbers=dn)
    y = y + conv2_b[None, :, None, None]
    y = lax.reduce_window(y, -jnp.inf, lax.max, (1, 1, 2, 2), (1, 1, 2, 2),
                          "VALID")
    y = jnp.maximum(y, 0.0)
    y = y.reshape(y.shape[0], -1)
    y = jnp.maximum(y @ fc1_w.T + fc1_b, 0.0)
    y = y @ fc2_w.T + fc2_b
    return jax.nn.log_softmax(y, axis=-1)


# ------------------------------------ main -------------------------------------

if __name__ == "__main__":
    root = jax.random.PRNGKey(0)
    kx, k0, k1, k2, k3, k4, k5, k6, k7 = jax.random.split(root, 9)

    # Deterministic synthetic parameters (PyTorch layouts).
    params = (
        jax.random.normal(k0, (10, 1, 5, 5), jnp.float32) * 0.1,    # conv1.weight
        jax.random.normal(k1, (10,), jnp.float32) * 0.1,            # conv1.bias
        jax.random.normal(k2, (20, 10, 5, 5), jnp.float32) * 0.1,   # conv2.weight
        jax.random.normal(k3, (20,), jnp.float32) * 0.1,            # conv2.bias
        jax.random.normal(k4, (50, 320), jnp.float32) * 0.05,       # fc1.weight
        jax.random.normal(k5, (50,), jnp.float32) * 0.05,           # fc1.bias
        jax.random.normal(k6, (10, 50), jnp.float32) * 0.1,         # fc2.weight
        jax.random.normal(k7, (10,), jnp.float32) * 0.1,            # fc2.bias
    )

    fwd = jax.jit(net_forward)

    # Small batch (spec shape: 28x28 spatial is implied by fc1(320)).
    x = jax.random.normal(kx, (2, 1, 28, 28), jnp.float32)
    out = jax.block_until_ready(fwd(x, params))
    ref = jax.block_until_ready(reference_forward(x, params))
    assert out.shape == (2, 10), out.shape
    assert np.all(np.isfinite(np.asarray(out)))
    np.testing.assert_allclose(np.asarray(out), np.asarray(ref),
                               rtol=2e-3, atol=2e-3)

    # Larger batch: exercises the multi-step batch-tiled grid + padding path.
    x2 = jax.random.normal(jax.random.PRNGKey(1), (20, 1, 28, 28), jnp.float32)
    out2 = jax.block_until_ready(fwd(x2, params))
    ref2 = jax.block_until_ready(reference_forward(x2, params))
    assert out2.shape == (20, 10), out2.shape
    np.testing.assert_allclose(np.asarray(out2), np.asarray(ref2),
                               rtol=2e-3, atol=2e-3)

    print("KERNEL_OK")
</pallas_src>

<mosaic_0001>
module attributes {stable_mosaic.version = 11 : i64} {
  func.func @_fused_net_kernel(%arg0: i32, %arg1: memref<8x28x28xf32, #tpu.memory_space<vmem>>, %arg2: memref<140x240xf32, #tpu.memory_space<vmem>>, %arg3: memref<1x240xf32, #tpu.memory_space<vmem>>, %arg4: memref<12x23xf32, #tpu.memory_space<vmem>>, %arg5: memref<1150x160xf32, #tpu.memory_space<vmem>>, %arg6: memref<1x160xf32, #tpu.memory_space<vmem>>, %arg7: memref<4x7xf32, #tpu.memory_space<vmem>>, %arg8: memref<560x50xf32, #tpu.memory_space<vmem>>, %arg9: memref<1x50xf32, #tpu.memory_space<vmem>>, %arg10: memref<50x10xf32, #tpu.memory_space<vmem>>, %arg11: memref<1x10xf32, #tpu.memory_space<vmem>>, %arg12: memref<8x10xf32, #tpu.memory_space<vmem>>, %arg13: memref<8x560xf32, #tpu.memory_space<vmem>>) attributes {dimension_semantics = [#tpu.dimension_semantics<parallel>], iteration_bounds = array<i64: 1>, scalar_prefetch = 0 : i64, scratch_operands = 1 : i64, tpu.core_type = #tpu.core_type<tc>, window_params = [{transform_indices = @transform_0, window_bounds = array<i64: 8, 28, 28>}, {pipeline_mode = #tpu.pipeline_mode<synchronous>, transform_indices = @transform_1, window_bounds = array<i64: 140, 240>}, {pipeline_mode = #tpu.pipeline_mode<synchronous>, transform_indices = @transform_2, window_bounds = array<i64: 1, 240>}, {pipeline_mode = #tpu.pipeline_mode<synchronous>, transform_indices = @transform_3, window_bounds = array<i64: 12, 23>}, {pipeline_mode = #tpu.pipeline_mode<synchronous>, transform_indices = @transform_4, window_bounds = array<i64: 1150, 160>}, {pipeline_mode = #tpu.pipeline_mode<synchronous>, transform_indices = @transform_5, window_bounds = array<i64: 1, 160>}, {pipeline_mode = #tpu.pipeline_mode<synchronous>, transform_indices = @transform_6, window_bounds = array<i64: 4, 7>}, {pipeline_mode = #tpu.pipeline_mode<synchronous>, transform_indices = @transform_7, window_bounds = array<i64: 560, 50>}, {pipeline_mode = #tpu.pipeline_mode<synchronous>, transform_indices = @transform_8, window_bounds = array<i64: 1, 50>}, {pipeline_mode = #tpu.pipeline_mode<synchronous>, transform_indices = @transform_9, window_bounds = array<i64: 50, 10>}, {pipeline_mode = #tpu.pipeline_mode<synchronous>, transform_indices = @transform_10, window_bounds = array<i64: 1, 10>}, {transform_indices = @transform_11, window_bounds = array<i64: 8, 10>}]} {
    %c0_i32 = arith.constant 0 : i32
    %c8_i32 = arith.constant 8 : i32
    %0 = arith.addi %c0_i32, %c8_i32 : i32
    %c1_i32 = arith.constant 1 : i32
    scf.for %arg14 = %c0_i32 to %0 step %c1_i32  : i32 {
      %c1_i32_16 = arith.constant 1 : i32
      %26 = arith.muli %arg14, %c1_i32_16 : i32
      %c0_i32_17 = arith.constant 0 : i32
      %27 = arith.addi %c0_i32_17, %26 : i32
      %28 = arith.index_cast %27 : i32 to index
      %c0_18 = arith.constant 0 : index
      %c0_19 = arith.constant 0 : index
      %29 = vector.load %arg1[%28, %c0_18, %c0_19] : memref<8x28x28xf32, #tpu.memory_space<vmem>>, vector<1x28x28xf32>
      %30 = vector.shape_cast %29 : vector<1x28x28xf32> to vector<28x28xf32>
      %31 = vector.extract_strided_slice %30 {offsets = [0, 0], sizes = [24, 28], strides = [1, 1]} : vector<28x28xf32> to vector<24x28xf32>
      %32 = vector.extract_strided_slice %30 {offsets = [1, 0], sizes = [24, 28], strides = [1, 1]} : vector<28x28xf32> to vector<24x28xf32>
      %33 = vector.extract_strided_slice %30 {offsets = [2, 0], sizes = [24, 28], strides = [1, 1]} : vector<28x28xf32> to vector<24x28xf32>
      %34 = vector.extract_strided_slice %30 {offsets = [3, 0], sizes = [24, 28], strides = [1, 1]} : vector<28x28xf32> to vector<24x28xf32>
      %35 = vector.extract_strided_slice %30 {offsets = [4, 0], sizes = [24, 28], strides = [1, 1]} : vector<28x28xf32> to vector<24x28xf32>
      %36 = tpu.concatenate %31, %32, %33, %34, %35 in 1 : vector<24x28xf32>, vector<24x28xf32>, vector<24x28xf32>, vector<24x28xf32>, vector<24x28xf32> -> vector<24x140xf32>
      %c0_20 = arith.constant 0 : index
      %c0_21 = arith.constant 0 : index
      %37 = vector.load %arg2[%c0_20, %c0_21] : memref<140x240xf32, #tpu.memory_space<vmem>>, vector<140x240xf32>
      %cst_22 = arith.constant dense<0.000000e+00> : vector<24x240xf32>
      %38 = tpu.matmul %36, %37, %cst_22 {dimension_numbers = #tpu.dot_dimension_numbers<[1], [0], [0], [1], [0, 0, 1, 1], [], []>} : vector<24x140xf32>, vector<140x240xf32>, vector<24x240xf32> -> vector<24x240xf32>
      %c0_23 = arith.constant 0 : index
      %c0_24 = arith.constant 0 : index
      %39 = vector.load %arg3[%c0_23, %c0_24] : memref<1x240xf32, #tpu.memory_space<vmem>>, vector<1x240xf32>
      %40 = vector.broadcast %39 : vector<1x240xf32> to vector<24x240xf32>
      %41 = arith.addf %38, %40 : vector<24x240xf32>
      %42 = vector.extract_strided_slice %41 {offsets = [0, 0], sizes = [23, 240], strides = [1, 1]} : vector<24x240xf32> to vector<23x240xf32>
      %43 = vector.extract_strided_slice %41 {offsets = [1, 0], sizes = [23, 240], strides = [1, 1]} : vector<24x240xf32> to vector<23x240xf32>
      %44 = arith.maximumf %42, %43 : vector<23x240xf32>
      %c0_25 = arith.constant 0 : index
      %c0_26 = arith.constant 0 : index
      %45 = vector.load %arg4[%c0_25, %c0_26] : memref<12x23xf32, #tpu.memory_space<vmem>>, vector<12x23xf32>
      %cst_27 = arith.constant dense<0.000000e+00> : vector<12x240xf32>
      %46 = tpu.matmul %45, %44, %cst_27 {dimension_numbers = #tpu.dot_dimension_numbers<[1], [0], [0], [1], [0, 0, 1, 1], [], []>} : vector<12x23xf32>, vector<23x240xf32>, vector<12x240xf32> -> vector<12x240xf32>
      %47 = vector.extract_strided_slice %46 {offsets = [0, 0], sizes = [12, 230], strides = [1, 1]} : vector<12x240xf32> to vector<12x230xf32>
      %48 = vector.extract_strided_slice %46 {offsets = [0, 10], sizes = [12, 230], strides = [1, 1]} : vector<12x240xf32> to vector<12x230xf32>
      %49 = arith.maximumf %47, %48 : vector<12x230xf32>
      %cst_28 = arith.constant 0.000000e+00 : f32
      %50 = vector.broadcast %cst_28 : f32 to vector<12x230xf32>
      %51 = arith.maximumf %49, %50 : vector<12x230xf32>
      %52 = vector.extract_strided_slice %51 {offsets = [0, 0], sizes = [8, 230], strides = [1, 1]} : vector<12x230xf32> to vector<8x230xf32>
      %53 = vector.extract_strided_slice %51 {offsets = [1, 0], sizes = [8, 230], strides = [1, 1]} : vector<12x230xf32> to vector<8x230xf32>
      %54 = vector.extract_strided_slice %51 {offsets = [2, 0], sizes = [8, 230], strides = [1, 1]} : vector<12x230xf32> to vector<8x230xf32>
      %55 = vector.extract_strided_slice %51 {offsets = [3, 0], sizes = [8, 230], strides = [1, 1]} : vector<12x230xf32> to vector<8x230xf32>
      %56 = vector.extract_strided_slice %51 {offsets = [4, 0], sizes = [8, 230], strides = [1, 1]} : vector<12x230xf32> to vector<8x230xf32>
      %57 = tpu.concatenate %52, %53, %54, %55, %56 in 1 : vector<8x230xf32>, vector<8x230xf32>, vector<8x230xf32>, vector<8x230xf32>, vector<8x230xf32> -> vector<8x1150xf32>
      %c0_29 = arith.constant 0 : index
      %c0_30 = arith.constant 0 : index
      %58 = vector.load %arg5[%c0_29, %c0_30] : memref<1150x160xf32, #tpu.memory_space<vmem>>, vector<1150x160xf32>
      %cst_31 = arith.constant dense<0.000000e+00> : vector<8x160xf32>
      %59 = tpu.matmul %57, %58, %cst_31 {dimension_numbers = #tpu.dot_dimension_numbers<[1], [0], [0], [1], [0, 0, 1, 1], [], []>} : vector<8x1150xf32>, vector<1150x160xf32>, vector<8x160xf32> -> vector<8x160xf32>
      %c0_32 = arith.constant 0 : index
      %c0_33 = arith.constant 0 : index
      %60 = vector.load %arg6[%c0_32, %c0_33] : memref<1x160xf32, #tpu.memory_space<vmem>>, vector<1x160xf32>
      %61 = vector.broadcast %60 : vector<1x160xf32> to vector<8x160xf32>
      %62 = arith.addf %59, %61 : vector<8x160xf32>
      %63 = vector.extract_strided_slice %62 {offsets = [0, 0], sizes = [7, 160], strides = [1, 1]} : vector<8x160xf32> to vector<7x160xf32>
      %64 = vector.extract_strided_slice %62 {offsets = [1, 0], sizes = [7, 160], strides = [1, 1]} : vector<8x160xf32> to vector<7x160xf32>
      %65 = arith.maximumf %63, %64 : vector<7x160xf32>
      %c0_34 = arith.constant 0 : index
      %c0_35 = arith.constant 0 : index
      %66 = vector.load %arg7[%c0_34, %c0_35] : memref<4x7xf32, #tpu.memory_space<vmem>>, vector<4x7xf32>
      %cst_36 = arith.constant dense<0.000000e+00> : vector<4x160xf32>
      %67 = tpu.matmul %66, %65, %cst_36 {dimension_numbers = #tpu.dot_dimension_numbers<[1], [0], [0], [1], [0, 0, 1, 1], [], []>} : vector<4x7xf32>, vector<7x160xf32>, vector<4x160xf32> -> vector<4x160xf32>
      %68 = vector.extract_strided_slice %67 {offsets = [0, 0], sizes = [4, 140], strides = [1, 1]} : vector<4x160xf32> to vector<4x140xf32>
      %69 = vector.extract_strided_slice %67 {offsets = [0, 20], sizes = [4, 140], strides = [1, 1]} : vector<4x160xf32> to vector<4x140xf32>
      %70 = arith.maximumf %68, %69 : vector<4x140xf32>
      %cst_37 = arith.constant 0.000000e+00 : f32
      %71 = vector.broadcast %cst_37 : f32 to vector<4x140xf32>
      %72 = arith.maximumf %70, %71 : vector<4x140xf32>
      %73 = vector.extract_strided_slice %72 {offsets = [0, 0], sizes = [1, 140], strides = [1, 1]} : vector<4x140xf32> to vector<1x140xf32>
      %74 = vector.extract_strided_slice %72 {offsets = [1, 0], sizes = [1, 140], strides = [1, 1]} : vector<4x140xf32> to vector<1x140xf32>
      %75 = vector.extract_strided_slice %72 {offsets = [2, 0], sizes = [1, 140], strides = [1, 1]} : vector<4x140xf32> to vector<1x140xf32>
      %76 = vector.extract_strided_slice %72 {offsets = [3, 0], sizes = [1, 140], strides = [1, 1]} : vector<4x140xf32> to vector<1x140xf32>
      %77 = tpu.concatenate %73, %74, %75, %76 in 1 : vector<1x140xf32>, vector<1x140xf32>, vector<1x140xf32>, vector<1x140xf32> -> vector<1x560xf32>
      %78 = arith.index_cast %27 : i32 to index
      %c0_38 = arith.constant 0 : index
      %79 = vector.load %arg13[%78, %c0_38] : memref<8x560xf32, #tpu.memory_space<vmem>>, vector<1x560xf32>
      tpu.vector_store %arg13[%78, %c0_38], %77 {strides = array<i32>} : memref<8x560xf32, #tpu.memory_space<vmem>>, vector<1x560xf32>,
    }
    %c8_i32_0 = arith.constant 8 : i32
    %c0 = arith.constant 0 : index
    %c0_1 = arith.constant 0 : index
    %1 = vector.load %arg13[%c0, %c0_1] : memref<8x560xf32, #tpu.memory_space<vmem>>, vector<8x560xf32>
    %c0_2 = arith.constant 0 : index
    %c0_3 = arith.constant 0 : index
    %2 = vector.load %arg8[%c0_2, %c0_3] : memref<560x50xf32, #tpu.memory_space<vmem>>, vector<560x50xf32>
    %cst = arith.constant dense<0.000000e+00> : vector<8x50xf32>
    %3 = tpu.matmul %1, %2, %cst {dimension_numbers = #tpu.dot_dimension_numbers<[1], [0], [0], [1], [0, 0, 1, 1], [], []>} : vector<8x560xf32>, vector<560x50xf32>, vector<8x50xf32> -> vector<8x50xf32>
    %c0_4 = arith.constant 0 : index
    %c0_5 = arith.constant 0 : index
    %4 = vector.load %arg9[%c0_4, %c0_5] : memref<1x50xf32, #tpu.memory_space<vmem>>, vector<1x50xf32>
    %5 = vector.broadcast %4 : vector<1x50xf32> to vector<8x50xf32>
    %6 = arith.addf %3, %5 : vector<8x50xf32>
    %cst_6 = arith.constant 0.000000e+00 : f32
    %7 = vector.broadcast %cst_6 : f32 to vector<8x50xf32>
    %8 = arith.maximumf %6, %7 : vector<8x50xf32>
    %c0_7 = arith.constant 0 : index
    %c0_8 = arith.constant 0 : index
    %9 = vector.load %arg10[%c0_7, %c0_8] : memref<50x10xf32, #tpu.memory_space<vmem>>, vector<50x10xf32>
    %cst_9 = arith.constant dense<0.000000e+00> : vector<8x10xf32>
    %10 = tpu.matmul %8, %9, %cst_9 {dimension_numbers = #tpu.dot_dimension_numbers<[1], [0], [0], [1], [0, 0, 1, 1], [], []>} : vector<8x50xf32>, vector<50x10xf32>, vector<8x10xf32> -> vector<8x10xf32>
    %c0_10 = arith.constant 0 : index
    %c0_11 = arith.constant 0 : index
    %11 = vector.load %arg11[%c0_10, %c0_11] : memref<1x10xf32, #tpu.memory_space<vmem>>, vector<1x10xf32>
    %12 = vector.broadcast %11 : vector<1x10xf32> to vector<8x10xf32>
    %13 = arith.addf %10, %12 : vector<8x10xf32>
    %cst_12 = arith.constant dense<0xFF800000> : vector<8xf32>
    %14 = vector.multi_reduction <maximumf>, %13, %cst_12 [1] : vector<8x10xf32> to vector<8xf32>
    %15 = vector.shape_cast %14 : vector<8xf32> to vector<8x1xf32>
    %16 = vector.broadcast %15 : vector<8x1xf32> to vector<8x10xf32>
    %17 = arith.subf %13, %16 : vector<8x10xf32>
    %18 = math.exp %17 : vector<8x10xf32>
    %cst_13 = arith.constant dense<0.000000e+00> : vector<8xf32>
    %19 = vector.multi_reduction <add>, %18, %cst_13 [1] : vector<8x10xf32> to vector<8xf32>
    %20 = vector.shape_cast %19 : vector<8xf32> to vector<8x1xf32>
    %21 = math.log %20 : vector<8x1xf32>
    %22 = arith.addf %15, %21 : vector<8x1xf32>
    %23 = vector.broadcast %22 : vector<8x1xf32> to vector<8x10xf32>
    %24 = arith.subf %13, %23 : vector<8x10xf32>
    %c0_14 = arith.constant 0 : index
    %c0_15 = arith.constant 0 : index
    %25 = vector.load %arg12[%c0_14, %c0_15] : memref<8x10xf32, #tpu.memory_space<vmem>>, vector<8x10xf32>
    tpu.vector_store %arg12[%c0_14, %c0_15], %24 {strides = array<i32>} : memref<8x10xf32, #tpu.memory_space<vmem>>, vector<8x10xf32>,
    return
  }
  func.func @transform_0(%arg0: i32) -> (i32, i32, i32) {
    %c0_i32 = arith.constant 0 : i32
    %c0_i32_0 = arith.constant 0 : i32
    %c0_i32_1 = arith.constant 0 : i32
    return %arg0, %c0_i32, %c0_i32_0 : i32, i32, i32
  }
  func.func @transform_1(%arg0: i32) -> (i32, i32) {
    %c0_i32 = arith.constant 0 : i32
    %c0_i32_0 = arith.constant 0 : i32
    %c0_i32_1 = arith.constant 0 : i32
    return %c0_i32, %c0_i32_0 : i32, i32
  }
  func.func @transform_2(%arg0: i32) -> (i32, i32) {
    %c0_i32 = arith.constant 0 : i32
    %c0_i32_0 = arith.constant 0 : i32
    %c0_i32_1 = arith.constant 0 : i32
    return %c0_i32, %c0_i32_0 : i32, i32
  }
  func.func @transform_3(%arg0: i32) -> (i32, i32) {
    %c0_i32 = arith.constant 0 : i32
    %c0_i32_0 = arith.constant 0 : i32
    %c0_i32_1 = arith.constant 0 : i32
    return %c0_i32, %c0_i32_0 : i32, i32
  }
  func.func @transform_4(%arg0: i32) -> (i32, i32) {
    %c0_i32 = arith.constant 0 : i32
    %c0_i32_0 = arith.constant 0 : i32
    %c0_i32_1 = arith.constant 0 : i32
    return %c0_i32, %c0_i32_0 : i32, i32
  }
  func.func @transform_5(%arg0: i32) -> (i32, i32) {
    %c0_i32 = arith.constant 0 : i32
    %c0_i32_0 = arith.constant 0 : i32
    %c0_i32_1 = arith.constant 0 : i32
    return %c0_i32, %c0_i32_0 : i32, i32
  }
  func.func @transform_6(%arg0: i32) -> (i32, i32) {
    %c0_i32 = arith.constant 0 : i32
    %c0_i32_0 = arith.constant 0 : i32
    %c0_i32_1 = arith.constant 0 : i32
    return %c0_i32, %c0_i32_0 : i32, i32
  }
  func.func @transform_7(%arg0: i32) -> (i32, i32) {
    %c0_i32 = arith.constant 0 : i32
    %c0_i32_0 = arith.constant 0 : i32
    %c0_i32_1 = arith.constant 0 : i32
    return %c0_i32, %c0_i32_0 : i32, i32
  }
  func.func @transform_8(%arg0: i32) -> (i32, i32) {
    %c0_i32 = arith.constant 0 : i32
    %c0_i32_0 = arith.constant 0 : i32
    %c0_i32_1 = arith.constant 0 : i32
    return %c0_i32, %c0_i32_0 : i32, i32
  }
  func.func @transform_9(%arg0: i32) -> (i32, i32) {
    %c0_i32 = arith.constant 0 : i32
    %c0_i32_0 = arith.constant 0 : i32
    %c0_i32_1 = arith.constant 0 : i32
    return %c0_i32, %c0_i32_0 : i32, i32
  }
  func.func @transform_10(%arg0: i32) -> (i32, i32) {
    %c0_i32 = arith.constant 0 : i32
    %c0_i32_0 = arith.constant 0 : i32
    %c0_i32_1 = arith.constant 0 : i32
    return %c0_i32, %c0_i32_0 : i32, i32
  }
  func.func @transform_11(%arg0: i32) -> (i32, i32) {
    %c0_i32 = arith.constant 0 : i32
    %c0_i32_0 = arith.constant 0 : i32
    return %arg0, %c0_i32 : i32, i32
  }
}

</mosaic_0001>

<bundles_post_ra>
// kernel: tile.13
= control target key start
LH: loop header
LB: loop body
LE: loop exit
PB: predicated region body
PF: predicated region fallthrough
CT: control target
= control target key end

     0   :  { %s34_s0 = inlined_call_operand.vmem [shape: f32[10], index: 0, kind: input, shape index: {}]   ;;  %s35_s1 = inlined_call_operand.vmem [shape: f32[24,10], index: 1, kind: output, shape index: {}]  }
   0x1   :  { %v4_v0 = vld [vmem:[%s34_s0] ss:$0 sm:$0xff] }
   0x2   :  { %5 = vst [vmem:[%s35_s1] sm:$0xff] %v4_v0 }
   0x3   :  { %10 = vst [vmem:[%s35_s1 + $0x8] sm:$0xff] %v4_v0 }
   0x4   :  { %11 = vst [vmem:[%s35_s1 + $0x10] sm:$0xff] %v4_v0 }

// kernel: tile.18
= control target key start
LH: loop header
LB: loop body
LE: loop exit
PB: predicated region body
PF: predicated region fallthrough
CT: control target
= control target key end

     0   :  { %s22_s0 = inlined_call_operand.vmem [shape: f32[20], index: 0, kind: input, shape index: {}]   ;;  %s23_s1 = inlined_call_operand.vmem [shape: f32[8,20], index: 1, kind: output, shape index: {}]  }
   0x1   :  { %v4_v0 = vld [vmem:[%s22_s0] ss:$0 sm:$0xff] }
   0x2   :  { %5 = vst [vmem:[%s23_s1] sm:$0xff] %v4_v0 }

// kernel: tile.14
= control target key start
LH: loop header
LB: loop body
LE: loop exit
PB: predicated region body
PF: predicated region fallthrough
CT: control target
= control target key end

     0   :  { %vm9_vm0 = vcmask 64512   ;;  %s221_s10 = smov 102   ;;  %s222_s13 = smov 120   ;;  %vm3_vm1 = vcmask 80896   ;;  %vm13_vm2 = vcmask 15360   ;;  %vm16_vm3 = vcmask 1048512   ;;  %s335_s0 = inlined_call_operand.vmem [shape: f32[24,10], index: 0, kind: input, shape index: {}]   ;;  %s336_s1 = inlined_call_operand.vmem [shape: f32[1,240], index: 1, kind: output, shape index: {}]  }
   0x1   :  { %v176_v0 = vld [vmem:[%s335_s0 + $0x17] sm:$0x1]   ;;  %v173_v1 = vld [vmem:[%s335_s0 + $0xc] sm:$0x1]   ;;  %v178_v4 = vld [vmem:[%s335_s0 + $0x16] sm:$0x1]  }
   0x2   :  { %26 = vrot.lane.b32.xlu1 %v176_v0, %s221_s10  ;;  %v174_v2 = vld [vmem:[%s335_s0 + $0xc] sm:$0x1]   ;;  %s223_s16 = smov 92   ;;  %v177_v5 = vld [vmem:[%s335_s0 + $0xa] sm:$0x1]   ;;  %s224_s21 = smov 100  }
   0x3   :  { %v10_v3 = vsel %vm9_vm0, %v174_v2, %v173_v1  ;;  %39 = vrot.lane.b32.xlu2 %v178_v4, %s223_s16  ;;  %v175_v6 = vld [vmem:[%s335_s0 + $0xb] sm:$0x1]   ;;  %v179_v7 = vld [vmem:[%s335_s0 + $0x9] sm:$0x1]   ;;  %s225_s24 = smov 110   ;;  %s226_s25 = smov 90  }
   0x4   :  { %11 = vrot.lane.b32.xlu0 %v10_v3, %s222_s13  ;;  %v181_v8 = vld [vmem:[%s335_s0 + $0x8] sm:$0x1]   ;;  %v180_v9 = vld [vmem:[%s335_s0 + $0x15] sm:$0x1]   ;;  %s227_s30 = smov 80   ;;  %s228_s4 = smov 82  }
   0x5   :  { %v182_v10 = vld [vmem:[%s335_s0 + $0x14] sm:$0x1]   ;;  %s229_s5 = smov 72   ;;  %v184_v11 = vld [vmem:[%s335_s0 + $0x13] sm:$0x1]   ;;  %s230_s10 = smov 62  }
   0x6   :  { %v183_v12 = vld [vmem:[%s335_s0 + $0x7] sm:$0x1]   ;;  %v185_v13 = vld [vmem:[%s335_s0 + $0x6] sm:$0x1]   ;;  %s231_s13 = smov 70   ;;  %s232_s14 = smov 60  }
   0x7   :  { %v187_v14 = vld [vmem:[%s335_s0 + $0x5] sm:$0x1]   ;;  %v186_v15 = vld [vmem:[%s335_s0 + $0x12] sm:$0x1]   ;;  %s233_s19 = smov 50   ;;  %s234_s22 = smov 52  }
   0x8   :  { %v188_v16 = vld [vmem:[%s335_s0 + $0x11] sm:$0x1]   ;;  %s235_s23 = smov 42   ;;  %v190_v17 = vld [vmem:[%s335_s0 + $0x10] sm:$0x1]   ;;  %s236_s28 = smov 32  }
   0x9   :  { %v189_v18 = vld [vmem:[%s335_s0 + $0x4] sm:$0x1]   ;;  %v191_v19 = vld [vmem:[%s335_s0 + $0x3] sm:$0x1]   ;;  %s237_s2 = smov 40   ;;  %s238_s3 = smov 30  }
   0xa   :  { %33 = vrot.lane.b32.xlu1 %v177_v5, %s224_s21  ;;  %v193_v20 = vld [vmem:[%s335_s0 + $0x2] sm:$0x1]   ;;  %v192_v21 = vld [vmem:[%s335_s0 + $0xf] sm:$0x1]   ;;  %s239_s8 = smov 20   ;;  %s240_s11 = smov 22  }
   0xb   :  { %46 = vrot.lane.b32.xlu2 %v179_v7, %s226_s25  ;;  %v194_v22 = vld [vmem:[%s335_s0 + $0xe] sm:$0x1]   ;;  %s241_s12 = smov 12   ;;  %v196_v23 = vld [vmem:[%s335_s0 + $0xd] sm:$0x1]   ;;  %s242_s17 = smov 2  }
   0xc   :  { %20 = vrot.lane.b32.xlu0 %v175_v6, %s225_s24  ;;  %v195_v24 = vld [vmem:[%s335_s0 + $0x1] sm:$0x1]   ;;  %s243_s18 = smov 10   ;;  %v2_v25 = vld [vmem:[%s335_s0] sm:$0x1]   ;;  %vm28_vm4 = vcmask 917296  }
   0xd   :  { %4 = vst.msk [vmem:[#allocation0] sm:$0x1] %vm3_vm1, %v2_v25   ;;  %vm41_vm5 = vcmask 835296   ;;  %vm22_vm6 = vcmask 982896   ;;  %vm35_vm7 = vcmask 900896   ;;  %vm48_vm8 = vcmask 818896  }
   0xe   :  { %vm61_vm9 = vcmask 736896   ;;  %vm54_vm10 = vcmask 753296   ;;  %vm67_vm11 = vcmask 671296   ;;  %vm80_vm12 = vcmask 589296  }
   0xf   :  { %vm74_vm13 = vcmask 654896   ;;  %vm87_vm14 = vcmask 572896   ;;  %vm100_vm15 = vcmask 490896   ;;  %vm93_vm0 = vcmask 507296  }
  0x10   :  { %vm106_vm1 = vcmask 425296  }
  0x12   :  { %59 = vrot.lane.b32.xlu1 %v181_v8, %s227_s30 }
  0x13   :  { %65 = vrot.lane.b32.xlu2 %v182_v10, %s229_s5 }
  0x14   :  { %52 = vrot.lane.b32.xlu0 %v180_v9, %s228_s4 }
  0x1a   :  { %78 = vrot.lane.b32.xlu1 %v184_v11, %s230_s10 }
  0x1b   :  { %85 = vrot.lane.b32.xlu2 %v185_v13, %s232_s14 }
  0x1c   :  { %72 = vrot.lane.b32.xlu0 %v183_v12, %s231_s13 }
  0x22   :  { %98 = vrot.lane.b32.xlu1 %v187_v14, %s233_s19 }
  0x23   :  { %104 = vrot.lane.b32.xlu2 %v188_v16, %s235_s23 }
  0x24   :  { %91 = vrot.lane.b32.xlu0 %v186_v15, %s234_s22 }
  0x2a   :  { %117 = vrot.lane.b32.xlu1 %v190_v17, %s236_s28 }
  0x2b   :  { %124 = vrot.lane.b32.xlu2 %v191_v19, %s238_s3 }
  0x2c   :  { %111 = vrot.lane.b32.xlu0 %v189_v18, %s237_s2 }
  0x32   :  { %137 = vrot.lane.b32.xlu1 %v193_v20, %s239_s8 }
  0x33   :  { %143 = vrot.lane.b32.xlu2 %v194_v22, %s241_s12 }
  0x34   :  { %130 = vrot.lane.b32.xlu0 %v192_v21, %s240_s11 }
  0x3a   :  { %156 = vrot.lane.b32.xlu1 %v196_v23, %s242_s17 }
  0x3c   :  { %150 = vrot.lane.b32.xlu0 %v195_v24, %s243_s18 }
  0x5d   :  { %v40_v26 = vpop.permute.xlu2 %39  }
  0x65   :  { %v47_v27 = vpop.permute.xlu2 %46  }
  0x6d   :  { %v66_v28 = vpop.permute.xlu2 %65  }
  0x74   :  { %v27_v29 = vpop.permute.xlu1 %26  }
  0x75   :  { %v86_v31 = vpop.permute.xlu2 %85  }
  0x76   :  { %v12_v30 = vpop.permute.xlu0 %11  }
  0x77   :  { %15 = vst.msk [vmem:[#allocation0 + $0x8] sm:$0x1] %vm13_vm2, %v12_v30   ;;  %vm119_vm2 = vcmask 343296  }
  0x78   :  { %17 = vst.msk [vmem:[#allocation0] sm:$0x1] %vm16_vm3, %v12_v30   ;;  %vm113_vm3 = vcmask 408896  }
  0x79   :  { %30 = vst.msk [vmem:[#allocation0 + $0x8] sm:$0x1] %vm28_vm4, %v27_v29   ;;  %vm126_vm4 = vcmask 326896  }
  0x7a   :  { %43 = vst.msk [vmem:[#allocation0 + $0x8] sm:$0x1] %vm41_vm5, %v40_v26   ;;  %vm139_vm5 = vcmask 244896  }
  0x7c   :  { %v34_v32 = vpop.permute.xlu1 %33  }
  0x7d   :  { %v105_v34 = vpop.permute.xlu2 %104  }
  0x7e   :  { %v21_v33 = vpop.permute.xlu0 %20  }
  0x7f   :  { %23 = vst.msk [vmem:[#allocation0] sm:$0x1] %vm22_vm6, %v21_v33   ;;  %vm132_vm6 = vcmask 261296  }
  0x80   :  { %36 = vst.msk [vmem:[#allocation0] sm:$0x1] %vm35_vm7, %v34_v32   ;;  %vm145_vm7 = vcmask 179296  }
  0x81   :  { %49 = vst.msk [vmem:[#allocation0] sm:$0x1] %vm48_vm8, %v47_v27   ;;  %vm158_vm8 = vcmask 97296  }
  0x84   :  { %v60_v35 = vpop.permute.xlu1 %59  }
  0x85   :  { %62 = vst.msk [vmem:[#allocation0] sm:$0x1] %vm61_vm9, %v60_v35   ;;  %v125_v37 = vpop.permute.xlu2 %124   ;;  %vm152_vm9 = vcmask 162896  }
  0x86   :  { %v53_v36 = vpop.permute.xlu0 %52  }
  0x87   :  { %56 = vst.msk [vmem:[#allocation0 + $0x8] sm:$0x1] %vm54_vm10, %v53_v36  }
  0x88   :  { %69 = vst.msk [vmem:[#allocation0 + $0x8] sm:$0x1] %vm67_vm11, %v66_v28  }
  0x8c   :  { %v79_v38 = vpop.permute.xlu1 %78  }
  0x8d   :  { %82 = vst.msk [vmem:[#allocation0 + $0x8] sm:$0x1] %vm80_vm12, %v79_v38   ;;  %v144_v40 = vpop.permute.xlu2 %143  }
  0x8e   :  { %v73_v39 = vpop.permute.xlu0 %72  }
  0x8f   :  { %75 = vst.msk [vmem:[#allocation0] sm:$0x1] %vm74_vm13, %v73_v39  }
  0x90   :  { %88 = vst.msk [vmem:[#allocation0] sm:$0x1] %vm87_vm14, %v86_v31  }
  0x94   :  { %v99_v41 = vpop.permute.xlu1 %98  }
  0x95   :  { %101 = vst.msk [vmem:[#allocation0] sm:$0x1] %vm100_vm15, %v99_v41  }
  0x96   :  { %v92_v42 = vpop.permute.xlu0 %91  }
  0x97   :  { %95 = vst.msk [vmem:[#allocation0 + $0x8] sm:$0x1] %vm93_vm0, %v92_v42  }
  0x98   :  { %108 = vst.msk [vmem:[#allocation0 + $0x8] sm:$0x1] %vm106_vm1, %v105_v34  }
  0x9c   :  { %v118_v43 = vpop.permute.xlu1 %117  }
  0x9d   :  { %121 = vst.msk [vmem:[#allocation0 + $0x8] sm:$0x1] %vm119_vm2, %v118_v43  }
  0x9e   :  { %v112_v44 = vpop.permute.xlu0 %111  }
  0x9f   :  { %114 = vst.msk [vmem:[#allocation0] sm:$0x1] %vm113_vm3, %v112_v44  }
  0xa0   :  { %127 = vst.msk [vmem:[#allocation0] sm:$0x1] %vm126_vm4, %v125_v37  }
  0xa4   :  { %v138_v45 = vpop.permute.xlu1 %137  }
  0xa5   :  { %140 = vst.msk [vmem:[#allocation0] sm:$0x1] %vm139_vm5, %v138_v45  }
  0xa6   :  { %v131_v46 = vpop.permute.xlu0 %130  }
  0xa7   :  { %134 = vst.msk [vmem:[#allocation0 + $0x8] sm:$0x1] %vm132_vm6, %v131_v46  }
  0xa8   :  { %147 = vst.msk [vmem:[#allocation0 + $0x8] sm:$0x1] %vm145_vm7, %v144_v40  }
  0xac   :  { %v157_v47 = vpop.permute.xlu1 %156  }
  0xad   :  { %160 = vst.msk [vmem:[#allocation0 + $0x8] sm:$0x1] %vm158_vm8, %v157_v47  }
  0xae   :  { %v151_v48 = vpop.permute.xlu0 %150  }
  0xaf   :  { %153 = vst.msk [vmem:[#allocation0] sm:$0x1] %vm152_vm9, %v151_v48  }
  0xb4   :  { %v168_v49 = vld [vmem:[#allocation0 + $0x8] sm:$0x1] }
  0xb5   :  { %197 = vst [vmem:[%s336_s1 + $0x1] sm:$0x1] %v168_v49 }
  0xb6   :  { %v163_v50 = vld [vmem:[#allocation0] sm:$0x1] }
  0xb7   :  { %166 = vst [vmem:[%s336_s1] sm:$0x1] %v163_v50 }

// kernel: tile.19
= control target key start
LH: loop header
LB: loop body
LE: loop exit
PB: predicated region body
PF: predicated region fallthrough
CT: control target
= control target key end

     0   :  { %vm9_vm0 = vcmask 64512   ;;  %s83_s12 = smov 120   ;;  %s84_s13 = smov 80   ;;  %vm3_vm1 = vcmask 162816   ;;  %vm13_vm2 = vcmask 97280   ;;  %vm16_vm3 = vcmask 1048512   ;;  %s133_s0 = inlined_call_operand.vmem [shape: f32[8,20], index: 0, kind: input, shape index: {}]   ;;  %s134_s1 = inlined_call_operand.vmem [shape: f32[1,160], index: 1, kind: output, shape index: {}]  }
   0x1   :  { %v67_v0 = vld [vmem:[%s133_s0 + $0x6] sm:$0x1]   ;;  %v70_v3 = vld [vmem:[%s133_s0 + $0x4] sm:$0x1]   ;;  %v72_v4 = vld [vmem:[%s133_s0 + $0x2] sm:$0x1]  }
   0x2   :  { %v68_v1 = vld [vmem:[%s133_s0 + $0x6] sm:$0x1]   ;;  %26 = vrot.lane.b32.xlu1 %v70_v3, %s84_s13  ;;  %s85_s16 = smov 40   ;;  %v69_v5 = vld [vmem:[%s133_s0 + $0x5] sm:$0x1]   ;;  %s86_s23 = smov 100  }
   0x3   :  { %v10_v2 = vsel %vm9_vm0, %v68_v1, %v67_v0  ;;  %38 = vrot.lane.b32.xlu2 %v72_v4, %s85_s16  ;;  %v71_v6 = vld [vmem:[%s133_s0 + $0x3] sm:$0x1]   ;;  %v73_v7 = vld [vmem:[%s133_s0 + $0x1] sm:$0x1]   ;;  %s87_s24 = smov 60   ;;  %s88_s25 = smov 20  }
   0x4   :  { %11 = vrot.lane.b32.xlu0 %v10_v2, %s83_s12  ;;  %v74_v8 = vld [vmem:[%s133_s0 + $0x7] sm:$0x1]   ;;  %s89_s28 = smov 12   ;;  %v2_v9 = vld [vmem:[%s133_s0] sm:$0x1]   ;;  %vm22_vm4 = vcmask 982816  }
   0x5   :  { %4 = vst.msk [vmem:[#allocation0] sm:$0x1] %vm3_vm1, %v2_v9   ;;  %vm28_vm5 = vcmask 818816   ;;  %vm34_vm6 = vcmask 654816   ;;  %vm40_vm7 = vcmask 490816   ;;  %vm46_vm8 = vcmask 326816  }
   0x6   :  { %vm52_vm9 = vcmask 261216  }
   0xa   :  { %32 = vrot.lane.b32.xlu1 %v71_v6, %s87_s24 }
   0xb   :  { %44 = vrot.lane.b32.xlu2 %v73_v7, %s88_s25 }
   0xc   :  { %20 = vrot.lane.b32.xlu0 %v69_v5, %s86_s23 }
  0x14   :  { %50 = vrot.lane.b32.xlu0 %v74_v8, %s89_s28 }
  0x5d   :  { %v39_v10 = vpop.permute.xlu2 %38  }
  0x65   :  { %v45_v11 = vpop.permute.xlu2 %44  }
  0x74   :  { %v27_v13 = vpop.permute.xlu1 %26  }
  0x76   :  { %v12_v12 = vpop.permute.xlu0 %11  }
  0x77   :  { %15 = vst.msk [vmem:[#allocation0 + $0x8] sm:$0x1] %vm13_vm2, %v12_v12  }
  0x78   :  { %17 = vst.msk [vmem:[#allocation0] sm:$0x1] %vm16_vm3, %v12_v12  }
  0x7c   :  { %v33_v15 = vpop.permute.xlu1 %32  }
  0x7e   :  { %v21_v14 = vpop.permute.xlu0 %20  }
  0x7f   :  { %23 = vst.msk [vmem:[#allocation0] sm:$0x1] %vm22_vm4, %v21_v14  }
  0x80   :  { %29 = vst.msk [vmem:[#allocation0] sm:$0x1] %vm28_vm5, %v27_v13  }
  0x81   :  { %35 = vst.msk [vmem:[#allocation0] sm:$0x1] %vm34_vm6, %v33_v15  }
  0x82   :  { %41 = vst.msk [vmem:[#allocation0] sm:$0x1] %vm40_vm7, %v39_v10  }
  0x83   :  { %47 = vst.msk [vmem:[#allocation0] sm:$0x1] %vm46_vm8, %v45_v11  }
  0x86   :  { %v51_v16 = vpop.permute.xlu0 %50  }
  0x87   :  { %54 = vst.msk [vmem:[#allocation0 + $0x8] sm:$0x1] %vm52_vm9, %v51_v16  }
  0x8a   :  { %v57_v17 = vld [vmem:[#allocation0] sm:$0x1] }
  0x8b   :  { %60 = vst [vmem:[%s134_s1] sm:$0x1] %v57_v17 }
  0x8e   :  { %v62_v18 = vld [vmem:[#allocation0 + $0x8] sm:$0x1] }
  0x8f   :  { %75 = vst [vmem:[%s134_s1 + $0x1] sm:$0x1] %v62_v18 }

// kernel: net_forward.1
= control target key start
LH: loop header
LB: loop body
LE: loop exit
PB: predicated region body
PF: predicated region fallthrough
CT: control target
= control target key end

     0   :  { %s1687_s17 = smov 0   ;;  %s3108_s0 = inlined_call_operand.vmem [shape: f32[8,28,28], index: 0, kind: input, shape index: {}]   ;;  %s3109_s1 = inlined_call_operand.vmem [shape: f32[140,240], index: 1, kind: input, shape index: {}]   ;;  %s3110_s2 = inlined_call_operand.vmem [shape: f32[1,240], index: 2, kind: input, shape index: {}]   ;;  %s3111_s3 = inlined_call_operand.vmem [shape: f32[12,23], index: 3, kind: input, shape index: {}]   ;;  %s3112_s4 = inlined_call_operand.vmem [shape: f32[1150,160], index: 4, kind: input, shape index: {}]   ;;  %s3113_s5 = inlined_call_operand.vmem [shape: f32[1,160], index: 5, kind: input, shape index: {}]   ;;  %s3114_s6 = inlined_call_operand.vmem [shape: f32[4,7], index: 6, kind: input, shape index: {}]   ;;  %s3115_s7 = inlined_call_operand.vmem [shape: f32[560,50], index: 7, kind: input, shape index: {}]   ;;  %s3116_s8 = inlined_call_operand.vmem [shape: f32[1,50], index: 8, kind: input, shape index: {}]   ;;  %s3117_s9 = inlined_call_operand.vmem [shape: f32[50,10], index: 9, kind: input, shape index: {}]   ;;  %s3118_s10 = inlined_call_operand.vmem [shape: f32[1,10], index: 10, kind: input, shape index: {}]   ;;  %s3119_s11 = inlined_call_operand.vmem [shape: f32[8,10], index: 11, kind: output, shape index: {}]  }
   0x1 LB: > { %v168_v0 = vld [vmem:[%s3109_s1 + $0xf0] sm:$0xff]  ;;  %v169_v1 = vld [vmem:[%s3109_s1 + $0xf8] sm:$0xff]  ;;  %v166_v2 = vld [vmem:[%s3109_s1 + $0xe0] sm:$0xff]  ;;  %s1529_s26 = sshll.u32 %s1613_s17, 5  ;;  %vm88_vm0 = vcmask 1044480   ;;  %vm54_vm1 = vcmask 1046528   ;;  %s1613_s17 = sphi %s1687_s17, %s43_s17  }
   0x2   : > { %193 = vmatpush.msra.mxu0 %v168_v0  ;;  %v167_v3 = vld [vmem:[%s3109_s1 + $0xe8] sm:$0xff]  ;;  %245 = vmatpush.msra.mxu2 %v169_v1  ;;  %v164_v4 = vld [vmem:[%s3109_s1 + $0xd0] sm:$0xff]  ;;  %s1711_s12 = scalar_lea.vmem %s3108_s0, %s1529_s26  ;;  %v165_v5 = vld [vmem:[%s3109_s1 + $0xd8] sm:$0xff]  ;;  %vm71_vm2 = vcmask 1045504   ;;  %s1615_s28 = smov 84   ;;  %vm105_vm3 = vcmask 1043456  }
   0x3   : > { %v162_v6 = vld [vmem:[%s3109_s1 + $0xc0] sm:$0xff]  ;;  %v1723_v8 = vld [vmem:[%s1711_s12 + $0x8] sm:$0xff]  ;;  %v1726_v9 = vld [vmem:[%s1711_s12 + $0x10] sm:$0xff]  ;;  %s1616_s13 = smov 28   ;;  %s1617_s19 = smov 112   ;;  %vm180_vm4 = vcmask 97280  }
   0x4   : > { %194 = vmatpush.msra.mxu0 %v166_v2  ;;  %v1720_v7 = vld [vmem:[%s1711_s12] sm:$0xff]  ;;  %246 = vmatpush.msra.mxu2 %v167_v3  ;;  %v90_v11 = vrot.slane %v1723_v8, 3  ;;  %v92_v12 = vrot.slane %v1726_v9, 3  ;;  %v163_v14 = vld [vmem:[%s3109_s1 + $0xc8] sm:$0xff]  ;;  %v56_v15 = vrot.slane %v1723_v8, 1  ;;  %v58_v16 = vrot.slane %v1726_v9, 1 }
   0x5   : > { %v89_v10 = vrot.slane %v1720_v7, 3  ;;  %v55_v13 = vrot.slane %v1720_v7, 1  ;;  %v160_v17 = vld [vmem:[%s3109_s1 + $0xb0] sm:$0xff]  ;;  %v72_v20 = vrot.slane %v1720_v7, 2  ;;  %v161_v21 = vld [vmem:[%s3109_s1 + $0xb8] sm:$0xff]  ;;  %v73_v25 = vrot.slane %v1723_v8, 2 }
   0x6   : > { %195 = vmatpush.msra.mxu0 %v164_v4  ;;  %247 = vmatpush.msra.mxu2 %v165_v5  ;;  %v93_v19 = vsel %vm88_vm0, %v90_v11, %v92_v12  ;;  %v59_v24 = vsel %vm54_vm1, %v56_v15, %v58_v16  ;;  %v158_v26 = vld [vmem:[%s3109_s1 + $0xa0] sm:$0xff]  ;;  %v75_v28 = vrot.slane %v1726_v9, 2  ;;  %v159_v29 = vld [vmem:[%s3109_s1 + $0xa8] sm:$0xff]  ;;  %v107_v30 = vrot.slane %v1723_v8, 4  ;;  %v156_v32 = vld [vmem:[%s3109_s1 + $0x90] sm:$0xff]  ;;  %s1619_s29 = smov 118  }
   0x7   : > { %v91_v18 = vsel %vm88_vm0, %v89_v10, %v90_v11  ;;  %v57_v23 = vsel %vm54_vm1, %v55_v13, %v56_v15  ;;  %v109_v31 = vrot.slane %v1726_v9, 4  ;;  %v106_v33 = vrot.slane %v1720_v7, 4  ;;  %v157_v34 = vld [vmem:[%s3109_s1 + $0x98] sm:$0xff]  ;;  %v154_v38 = vld [vmem:[%s3109_s1 + $0x80] sm:$0xff]  ;;  %v155_v40 = vld [vmem:[%s3109_s1 + $0x88] sm:$0xff]  ;;  %s1620_s18 = smov 102  }
   0x8   : > { %196 = vmatpush.msra.mxu0 %v162_v6  ;;  %v1586_v22 = vpack.i.bf16 %v93_v19, %v91_v18  ;;  %248 = vmatpush.msra.mxu2 %v163_v14  ;;  %v1576_v27 = vpack.i.bf16 %v59_v24, %v57_v23  ;;  %v74_v35 = vsel %vm71_vm2, %v72_v20, %v73_v25  ;;  %v49_v39 = vld [vmem:[%s1711_s12 + $0x18] sm:$0xf]  ;;  %v152_v42 = vld [vmem:[%s3109_s1 + $0x70] sm:$0xff]  ;;  %s1618_s12 = smov 56   ;;  %v150_v53 = vld [vmem:[%s3109_s1 + $0x60] sm:$0xff]  ;;  %vm122_vm5 = vcmask 228352  }
   0x9   : > { %v76_v36 = vsel %vm71_vm2, %v73_v25, %v75_v28  ;;  %v110_v37 = vsel %vm105_vm3, %v107_v30, %v109_v31  ;;  %v60_v41 = vrot.slane %v49_v39, 1  ;;  %v108_v43 = vsel %vm105_vm3, %v106_v33, %v107_v30  ;;  %v153_v45 = vld [vmem:[%s3109_s1 + $0x78] sm:$0xff]  ;;  %v151_v54 = vld [vmem:[%s3109_s1 + $0x68] sm:$0xff]  ;;  %v148_v55 = vld [vmem:[%s3109_s1 + $0x50] sm:$0xff]  ;;  %s1621_s30 = smov 76   ;;  %s1622_s27 = smov 24  }
   0xa   : > { %197 = vmatpush.msra.mxu0 %v160_v17  ;;  %1587 = vrot.lane.b32.xlu1 %v1586_v22, %s1615_s28  ;;  %v1581_v44 = vpack.i.bf16 %v76_v36, %v74_v35  ;;  %v94_v47 = vrot.slane %v49_v39, 3  ;;  %v77_v48 = vrot.slane %v49_v39, 2  ;;  %v111_v49 = vrot.slane %v49_v39, 4  ;;  %v149_v56 = vld [vmem:[%s3109_s1 + $0x58] sm:$0xff]  ;;  %v146_v57 = vld [vmem:[%s3109_s1 + $0x40] sm:$0xff]  ;;  %v147_v58 = vld [vmem:[%s3109_s1 + $0x48] sm:$0xff] }
   0xb   : > { %249 = vmatpush.msra.mxu2 %v161_v21  ;;  %1577 = vrot.lane.b32.xlu0 %v1576_v27, %s1616_s13  ;;  %v61_v46 = vsel %vm54_vm1, %v58_v16, %v60_v41  ;;  %v172_v59 = vld [vmem:[%s3109_s1 + $0x110] sm:$0xf]  ;;  %v173_v60 = vld [vmem:[%s3109_s1 + $0x118] sm:$0xf]  ;;  %v170_v63 = vld [vmem:[%s3109_s1 + $0x100] sm:$0xff]  ;;  %vm126_vm6 = vcmask 457728  }
   0xc   : > { %198 = vmatpush.msra.mxu0 %v158_v26  ;;  %115 = vrot.lane.b32.xlu2 %v110_v37, %s1617_s19  ;;  %v95_v50 = vsel %vm88_vm0, %v92_v12, %v94_v47  ;;  %v78_v51 = vsel %vm71_vm2, %v75_v28, %v77_v48  ;;  %v112_v52 = vsel %vm105_vm3, %v109_v31, %v111_v49  ;;  %v144_v61 = vld [vmem:[%s3109_s1 + $0x30] sm:$0xff]  ;;  %v145_v62 = vld [vmem:[%s3109_s1 + $0x38] sm:$0xff]  ;;  %v171_v0 = vld [vmem:[%s3109_s1 + $0x108] sm:$0xff]  ;;  %vm130_vm7 = vcmask 687104   ;;  %s1623_s14 = smov 50   ;;  %s1625_s15 = smov 12  }
   0xd   : > { %250 = vmatpush.msra.mxu2 %v159_v29  ;;  %1530 = vmatpush.msk.msra.mxu1 %vm105_vm3, %v172_v59  ;;  %v142_v1 = vld [vmem:[%s3109_s1 + $0x20] sm:$0xff]  ;;  %v143_v2 = vld [vmem:[%s3109_s1 + $0x28] sm:$0xff]  ;;  %v140_v3 = vld [vmem:[%s3109_s1 + $0x10] sm:$0xff]  ;;  %vm134_vm8 = vcmask 916480   ;;  %vm327_vm9 = vcmask 187392   ;;  %vm398_vm10 = vcmask 965632  }
   0xe   : > { %199 = vmatpush.msra.mxu0 %v156_v32  ;;  %1534 = vmatpush.msk.msra.mxu3 %vm105_vm3, %v173_v60  ;;  %v141_v4 = vld [vmem:[%s3109_s1 + $0x18] sm:$0xff]  ;;  %v138_v5 = vld [vmem:[%s3109_s1] sm:$0xff]  ;;  %v139_v6 = vld [vmem:[%s3109_s1 + $0x8] sm:$0xff]  ;;  %vm427_vm11 = vcmask 834560   ;;  %vm442_vm12 = vcmask 621568   ;;  %vm457_vm13 = vcmask 408576  }
   0xf   : > { %251 = vmatpush.msra.mxu2 %v157_v34  ;;  %234 = vmatpush.msra.mxu1 %v170_v63  ;;  %vm472_vm14 = vcmask 195584   ;;  %vm773_vm15 = vcmask 1031168   ;;  %s1267_s16 = sshra.s32 %s1613_s17, 3 }
  0x10   : > { %200 = vmatpush.msra.mxu0 %v154_v38  ;;  %286 = vmatpush.msra.mxu3 %v171_v0  ;;  %v174_v38 = vld [vmem:[%s3110_s2] sm:$0x3] }
  0x11   : > { %252 = vmatpush.msra.mxu2 %v155_v40  ;;  %v176_v40 = vperm.slane %v174_v38, 0 }
  0x12   : > { %201 = vmatpush.msra.mxu0 %v152_v42  ;;  %113 = vrot.lane.b32.xlu1 %v108_v43, %s1617_s19 }
  0x13   : > { %253 = vmatpush.msra.mxu2 %v153_v45  ;;  %1582 = vrot.lane.b32.xlu0 %v1581_v44, %s1618_s12  ;;  %v177_v45 = vperm.slane %v174_v38, 1  ;;  %v571_v38 = vld [vmem:[%s3112_s4 + $0x2e0] sm:$0xff] }
  0x14   : > { %66 = vrot.lane.b32.xlu2 %v61_v46, %s1616_s13  ;;  %202 = vmatpush.msra.mxu0 %v150_v53 }
  0x15   : > { %254 = vmatpush.msra.mxu2 %v151_v54 }
  0x16   : > { %203 = vmatpush.msra.mxu0 %v148_v55 }
  0x17   : > { %255 = vmatpush.msra.mxu2 %v149_v56 }
  0x18   : > { %204 = vmatpush.msra.mxu0 %v146_v57 }
  0x19   : > { %256 = vmatpush.msra.mxu2 %v147_v58 }
  0x1a   : > { %100 = vrot.lane.b32.xlu1 %v95_v50, %s1615_s28  ;;  %205 = vmatpush.msra.mxu0 %v144_v61  ;;  %s1626_s28 = smov 36  }
  0x1b   : > { %83 = vrot.lane.b32.xlu0 %v78_v51, %s1618_s12  ;;  %257 = vmatpush.msra.mxu2 %v145_v62 }
  0x1c   : > { %117 = vrot.lane.b32.xlu2 %v112_v52, %s1617_s19  ;;  %206 = vmatpush.msra.mxu0 %v142_v1  ;;  %s1270_s19 = sand.u32 7, %s1613_s17  ;;  %s43_s17 = sadd.s32 1, %s1613_s17  }
  0x1d   : > { %258 = vmatpush.msra.mxu2 %v143_v2  ;;  %p40_p0 = scmp.ge.s32.totalorder %s43_s17, 8  }
  0x1e   : > { %207 = vmatpush.msra.mxu0 %v140_v3 }
  0x1f   : > { %259 = vmatpush.msra.mxu2 %v141_v4 }
  0x20   : > { %208 = vmatpush.msra.mxu0 %v138_v5 }
  0x21   : > { %260 = vmatpush.msra.mxu2 %v139_v6 }
  0x66   : > { %v116_v12 = vpop.permute.xlu2 %115 }
  0x6e   : > { %v67_v24 = vpop.permute.xlu2 %66 }
  0x6f   : > { %v125_v28 = vsel %vm122_vm5, %v1726_v9, %v67_v24  ;;  %v497_v24 = vld [vmem:[%s3112_s4 + $0x90] sm:$0xff] }
  0x76   : > { %v118_v32 = vpop.permute.xlu2 %117 }
  0x7c   : > { %v1588_v10 = vpop.permute.xlu1 %1587 }
  0x7d   : > { %v1578_v11 = vpop.permute.xlu0 %1577  ;;  %v1589_v17 = vunpack.i.l.bf16 %v1588_v10  ;;  %v1590_v27 = vunpack.i.h.bf16 %v1588_v10 }
  0x7e   : > { %v1579_v13 = vunpack.i.l.bf16 %v1578_v11  ;;  %v1580_v18 = vunpack.i.h.bf16 %v1578_v11 }
  0x80   : > { %v123_v19 = vsel %vm122_vm5, %v1720_v7, %v1579_v13  ;;  %v124_v25 = vsel %vm122_vm5, %v1723_v8, %v1580_v18  ;;  %v325_v13 = vld [vmem:[%s3111_s3] sm:$0xff]  ;;  %v509_v18 = vld [vmem:[%s3112_s4 + $0xf0] sm:$0xff]  ;;  %vm1256_vm5 = vcmask 1041408  }
  0x84   : > { %v114_v14 = vpop.permute.xlu1 %113 }
  0x85   : > { %v1583_v15 = vpop.permute.xlu0 %1582  ;;  %1531 = vmatmul.msk.f32.vlgmr.msra.gmra.mxu1 %vm180_vm4, %v114_v14  ;;  %1535 = vmatmul.msk.f32.vlgmr.msra.gmra.mxu3 %vm180_vm4, %v114_v14 }
  0x86   : > { %v1584_v16 = vunpack.i.l.bf16 %v1583_v15  ;;  %v1585_v20 = vunpack.i.h.bf16 %v1583_v15 }
  0x88   : > { %v127_v21 = vsel %vm126_vm6, %v123_v19, %v1584_v16  ;;  %v128_v26 = vsel %vm126_vm6, %v124_v25, %v1585_v20  ;;  %v507_v19 = vld [vmem:[%s3112_s4 + $0xe0] sm:$0xff]  ;;  %v505_v20 = vld [vmem:[%s3112_s4 + $0xd0] sm:$0xff] }
  0x89   : > { %v131_v22 = vsel %vm130_vm7, %v127_v21, %v1589_v17  ;;  %v132_v7 = vsel %vm130_vm7, %v128_v26, %v1590_v27  ;;  %v326_v17 = vld [vmem:[%s3111_s3 + $0x8] sm:$0xf]  ;;  %v503_v21 = vld [vmem:[%s3112_s4 + $0xc0] sm:$0xff]  ;;  %v493_v27 = vld [vmem:[%s3112_s4 + $0x70] sm:$0xff] }
  0x8a   : > { %v135_v23 = vsel %vm134_vm8, %v131_v22, %v114_v14  ;;  %v136_v30 = vsel %vm134_vm8, %v132_v7, %v116_v12  ;;  %v501_v22 = vld [vmem:[%s3112_s4 + $0xb0] sm:$0xff]  ;;  %v495_v26 = vld [vmem:[%s3112_s4 + $0x80] sm:$0xff] }
  0x8b   : > { %209 = vmatmul.f32.vlgmr.msra.gmra.mxu0 %v135_v23  ;;  %261 = vmatmul.f32.vlgmr.msra.gmra.mxu2 %v135_v23  ;;  %v499_v23 = vld [vmem:[%s3112_s4 + $0xa0] sm:$0xff] }
  0x8c   : > { %v101_v31 = vpop.permute.xlu1 %100  ;;  %v491_v7 = vld [vmem:[%s3112_s4 + $0x60] sm:$0xff] }
  0x8d   : > { %1532 = vmatmul.msk.f32.gmra.mxu1 %vm180_vm4, %v116_v12  ;;  %1536 = vmatmul.msk.f32.gmra.mxu3 %vm180_vm4, %v116_v12  ;;  %v84_v29 = vpop.permute.xlu0 %83 }
  0x8e   : > { %v129_v8 = vsel %vm126_vm6, %v125_v28, %v84_v29  ;;  %v489_v28 = vld [vmem:[%s3112_s4 + $0x50] sm:$0xff]  ;;  %vm1260_vm6 = vcmask 1042432  }
  0x8f   : > { %v133_v33 = vsel %vm130_vm7, %v129_v8, %v101_v31  ;;  %v485_v8 = vld [vmem:[%s3112_s4 + $0x30] sm:$0xff] }
  0x90   : > { %v137_v34 = vsel %vm134_vm8, %v133_v33, %v118_v32  ;;  %v483_v33 = vld [vmem:[%s3112_s4 + $0x20] sm:$0xff]  ;;  %vm1356_vm8 = vcmask (%p40_p0), 392192  }
  0x93   : > { %212 = vmatmul.f32.gmra.mxu0 %v136_v30  ;;  %264 = vmatmul.f32.gmra.mxu2 %v136_v30  ;;  %v487_v30 = vld [vmem:[%s3112_s4 + $0x40] sm:$0xff] }
  0x95   : > { %1533 = vmatmul.msk.f32.gmra.mxu1 %vm180_vm4, %v118_v32  ;;  %1537 = vmatmul.msk.f32.gmra.mxu3 %vm180_vm4, %v118_v32 }
  0x9b   : > { %215 = vmatmul.f32.gmra.mxu0 %v137_v34  ;;  %267 = vmatmul.f32.gmra.mxu2 %v137_v34  ;;  %v481_v34 = vld [vmem:[%s3112_s4 + $0x10] sm:$0xff] }
 0x102   : > { %v236_v9 = vpop.f32.mrf.mxu1 }
 0x108   : > { %v210_v35 = vpop.f32.mrf.mxu0  ;;  %v288_v36 = vpop.f32.mrf.mxu3 }
 0x109   : > { %v211_v43 = vadd.f32 %v210_v35, %v176_v40  ;;  %v541_v35 = vld [vmem:[%s3112_s4 + $0x1f0] sm:$0xff] }
 0x10a   : > { %v239_v41 = vpop.f32.mrf.mxu1 }
 0x10b   : > { %v237_v50 = vadd.f32 %v236_v9, %v211_v43  ;;  %v479_v9 = vld [vmem:[%s3112_s4] sm:$0xff] }
 0x10d   : > { %v303_v57 = vrot.slane %v237_v50, 1 }
 0x10e   : > { %v262_v37 = vpop.f32.mrf.mxu2 }
 0x10f   : > { %v263_v54 = vadd.f32 %v262_v37, %v177_v45  ;;  %v539_v37 = vld [vmem:[%s3112_s4 + $0x1e0] sm:$0xff] }
 0x110   : > { %v213_v39 = vpop.f32.mrf.mxu0  ;;  %v291_v47 = vpop.f32.mrf.mxu3 }
 0x111   : > { %v214_v42 = vadd.f32 %v213_v39, %v176_v40  ;;  %v289_v63 = vadd.f32 %v288_v36, %v263_v54  ;;  %v573_v36 = vld [vmem:[%s3112_s4 + $0x2f0] sm:$0xff] }
 0x112   : > { %v242_v52 = vpop.f32.mrf.mxu1  ;;  %822 = vmatpush.msrb.mxu0 %v573_v36  ;;  %v537_v39 = vld [vmem:[%s3112_s4 + $0x1d0] sm:$0xff] }
 0x113   : > { %v240_v46 = vadd.f32 %v239_v41, %v214_v42  ;;  %v306_v10 = vrot.slane %v289_v63, 1  ;;  %v605_v41 = vld [vmem:[%s3112_s4 + $0x3f0] sm:$0xff] }
 0x114   : > { %v637_v42 = vld [vmem:[%s3112_s4 + $0x4f0] sm:$0xff]  ;;  %823 = vmatpush.msrb.mxu0 %v571_v38  ;;  %842 = vmatpush.msrb.mxu2 %v605_v41  ;;  %v551_v41 = vld [vmem:[%s3112_s4 + $0x240] sm:$0xff] }
 0x115   : > { %v304_v55 = vrot.slane %v240_v46, 1  ;;  %v621_v38 = vld [vmem:[%s3112_s4 + $0x470] sm:$0xff] }
 0x116   : > { %v265_v44 = vpop.f32.mrf.mxu2 }
 0x117   : > { %v266_v51 = vadd.f32 %v265_v44, %v177_v45  ;;  %v305_v2 = vsel %vm54_vm1, %v303_v57, %v304_v55  ;;  %v603_v44 = vld [vmem:[%s3112_s4 + $0x3e0] sm:$0xff] }
 0x118   : > { %v216_v48 = vpop.f32.mrf.mxu0  ;;  %v294_v0 = vpop.f32.mrf.mxu3  ;;  %v319_v6 = vmax.f32 %v237_v50, %v305_v2  ;;  %v633_v50 = vld [vmem:[%s3112_s4 + $0x4d0] sm:$0xff]  ;;  %843 = vmatpush.msrb.mxu2 %v603_v44  ;;  %v531_v57 = vld [vmem:[%s3112_s4 + $0x1a0] sm:$0xff] }
 0x119   : > { %v217_v49 = vadd.f32 %v216_v48, %v176_v40  ;;  %v292_v58 = vadd.f32 %v291_v47, %v266_v51  ;;  %v569_v40 = vld [vmem:[%s3112_s4 + $0x2d0] sm:$0xff]  ;;  %v567_v47 = vld [vmem:[%s3112_s4 + $0x2c0] sm:$0xff] }
 0x11a   : > { %824 = vmatpush.msrb.mxu0 %v569_v40  ;;  %v595_v2 = vld [vmem:[%s3112_s4 + $0x3a0] sm:$0xff] }
 0x11b   : > { %v243_v53 = vadd.f32 %v242_v52, %v217_v49  ;;  %v307_v4 = vrot.slane %v292_v58, 1  ;;  %v601_v49 = vld [vmem:[%s3112_s4 + $0x3d0] sm:$0xff]  ;;  %v519_v40 = vld [vmem:[%s3112_s4 + $0x140] sm:$0xff] }
 0x11c   : > { %v533_v52 = vld [vmem:[%s3112_s4 + $0x1b0] sm:$0xff]  ;;  %825 = vmatpush.msrb.mxu0 %v567_v47  ;;  %844 = vmatpush.msrb.mxu2 %v601_v49  ;;  %v587_v44 = vld [vmem:[%s3112_s4 + $0x360] sm:$0xff] }
 0x11d   : > { %v309_v56 = vrot.slane %v243_v53, 1  ;;  %v308_v15 = vsel %vm54_vm1, %v306_v10, %v307_v4  ;;  %v593_v10 = vld [vmem:[%s3112_s4 + $0x390] sm:$0xff] }
 0x11e   : > { %v268_v59 = vpop.f32.mrf.mxu2  ;;  %v320_v16 = vmax.f32 %v289_v63, %v308_v15  ;;  %v629_v63 = vld [vmem:[%s3112_s4 + $0x4b0] sm:$0xff] }
 0x11f   : > { %v269_v60 = vadd.f32 %v268_v59, %v177_v45  ;;  %v323_v61 = vmax.f32 %v243_v53, %v309_v56  ;;  %v310_v62 = vsel %vm54_vm1, %v304_v55, %v309_v56  ;;  %v635_v45 = vld [vmem:[%s3112_s4 + $0x4e0] sm:$0xff]  ;;  %v565_v53 = vld [vmem:[%s3112_s4 + $0x2b0] sm:$0xff] }
 0x120   : > { %v321_v1 = vmax.f32 %v240_v46, %v310_v62  ;;  %v535_v46 = vld [vmem:[%s3112_s4 + $0x1c0] sm:$0xff]  ;;  %826 = vmatpush.msrb.mxu0 %v565_v53  ;;  %v529_v62 = vld [vmem:[%s3112_s4 + $0x190] sm:$0xff] }
 0x121   : > { %v295_v3 = vadd.f32 %v294_v0, %v269_v60  ;;  %1538 = vmatpush.msk.msrb.mxu1 %vm54_vm1, %v323_v61  ;;  %v599_v55 = vld [vmem:[%s3112_s4 + $0x3c0] sm:$0xff]  ;;  %v597_v60 = vld [vmem:[%s3112_s4 + $0x3b0] sm:$0xff] }
 0x122   : > { %v631_v56 = vld [vmem:[%s3112_s4 + $0x4c0] sm:$0xff]  ;;  %845 = vmatpush.msrb.mxu2 %v599_v55  ;;  %v625_v15 = vld [vmem:[%s3112_s4 + $0x490] sm:$0xff] }
 0x123   : > { %v311_v5 = vrot.slane %v295_v3, 1  ;;  %354 = vmatpush.msrb.mxu1 %v321_v1  ;;  %v563_v59 = vld [vmem:[%s3112_s4 + $0x2a0] sm:$0xff]  ;;  %v561_v1 = vld [vmem:[%s3112_s4 + $0x290] sm:$0xff] }
 0x124   : > { %827 = vmatpush.msrb.mxu0 %v563_v59  ;;  %846 = vmatpush.msrb.mxu2 %v597_v60  ;;  %v517_v47 = vld [vmem:[%s3112_s4 + $0x130] sm:$0xff]  ;;  %v583_v60 = vld [vmem:[%s3112_s4 + $0x340] sm:$0xff] }
 0x125   : > { %355 = vmatpush.msrb.mxu1 %v319_v6  ;;  %v324_v11 = vmax.f32 %v295_v3, %v311_v5  ;;  %v312_v12 = vsel %vm54_vm1, %v307_v4, %v311_v5  ;;  %v527_v3 = vld [vmem:[%s3112_s4 + $0x180] sm:$0xff] }
 0x126   : > { %v322_v14 = vmax.f32 %v292_v58, %v312_v12  ;;  %1539 = vmatmul.msk.f32.vlgmr.msrb.gmra.mxu1 %vm327_vm9, %v325_v13  ;;  %v627_v4 = vld [vmem:[%s3112_s4 + $0x4a0] sm:$0xff]  ;;  %828 = vmatpush.msrb.mxu0 %v561_v1  ;;  %v581_v1 = vld [vmem:[%s3112_s4 + $0x330] sm:$0xff] }
 0x127   : > { %1541 = vmatpush.msk.msrb.mxu3 %vm54_vm1, %v324_v11  ;;  %782 = vmatpush.msra.mxu1 %v509_v18  ;;  %v559_v6 = vld [vmem:[%s3112_s4 + $0x280] sm:$0xff] }
 0x128   : > { %847 = vmatpush.msrb.mxu2 %v595_v2  ;;  %v591_v18 = vld [vmem:[%s3112_s4 + $0x380] sm:$0xff]  ;;  %829 = vmatpush.msrb.mxu0 %v559_v6 }
 0x129   : > { %377 = vmatpush.msrb.mxu3 %v322_v14  ;;  %783 = vmatpush.msra.mxu1 %v507_v19  ;;  %v525_v14 = vld [vmem:[%s3112_s4 + $0x170] sm:$0xff]  ;;  %v579_v6 = vld [vmem:[%s3112_s4 + $0x320] sm:$0xff] }
 0x12a   : > { %848 = vmatpush.msrb.mxu2 %v593_v10  ;;  %v611_v10 = vld [vmem:[%s3112_s4 + $0x420] sm:$0xff] }
 0x12b   : > { %378 = vmatpush.msrb.mxu3 %v320_v16  ;;  %784 = vmatpush.msra.mxu1 %v505_v20  ;;  %v523_v20 = vld [vmem:[%s3112_s4 + $0x160] sm:$0xff] }
 0x12c   : > { %1542 = vmatmul.msk.f32.vlgmr.msrb.gmra.mxu3 %vm327_vm9, %v325_v13  ;;  %849 = vmatpush.msrb.mxu2 %v591_v18  ;;  %v575_v18 = vld [vmem:[%s3112_s4 + $0x300] sm:$0xff] }
 0x12d   : > { %785 = vmatpush.msra.mxu1 %v503_v21  ;;  %802 = vmatpush.msra.mxu3 %v541_v35  ;;  %v623_v21 = vld [vmem:[%s3112_s4 + $0x480] sm:$0xff] }
 0x12e   : > { %1540 = vmatmul.msk.f32.gmra.mxu1 %vm327_vm9, %v326_v17 }
 0x12f   : > { %786 = vmatpush.msra.mxu1 %v501_v22  ;;  %803 = vmatpush.msra.mxu3 %v539_v37 }
 0x131   : > { %787 = vmatpush.msra.mxu1 %v499_v23  ;;  %804 = vmatpush.msra.mxu3 %v537_v39  ;;  %v555_v23 = vld [vmem:[%s3112_s4 + $0x260] sm:$0xff] }
 0x133   : > { %788 = vmatpush.msra.mxu1 %v497_v24  ;;  %805 = vmatpush.msra.mxu3 %v535_v46 }
 0x134   : > { %1543 = vmatmul.msk.f32.gmra.mxu3 %vm327_vm9, %v326_v17  ;;  %v557_v17 = vld [vmem:[%s3112_s4 + $0x270] sm:$0xff]  ;;  %vm1500_vm9 = vcmask (%p40_p0), 80896  }
 0x135   : > { %789 = vmatpush.msra.mxu1 %v495_v26  ;;  %806 = vmatpush.msra.mxu3 %v533_v52  ;;  %v617_v52 = vld [vmem:[%s3112_s4 + $0x450] sm:$0xff] }
 0x136   : > { %830 = vmatpush.msrb.mxu0 %v557_v17  ;;  %v699_v17 = vld [vmem:[%s3112_s4 + $0x6e0] sm:$0xff] }
 0x137   : > { %790 = vmatpush.msra.mxu1 %v493_v27  ;;  %807 = vmatpush.msra.mxu3 %v531_v57 }
 0x138   : > { %831 = vmatpush.msrb.mxu0 %v555_v23  ;;  %v765_v23 = vld [vmem:[%s3112_s4 + $0x8f0] sm:$0x3f] }
 0x139   : > { %791 = vmatpush.msra.mxu1 %v491_v7  ;;  %808 = vmatpush.msra.mxu3 %v529_v62 }
 0x13b   : > { %792 = vmatpush.msra.mxu1 %v489_v28  ;;  %809 = vmatpush.msra.mxu3 %v527_v3  ;;  %v613_v3 = vld [vmem:[%s3112_s4 + $0x430] sm:$0xff] }
 0x13d   : > { %793 = vmatpush.msra.mxu1 %v487_v30  ;;  %810 = vmatpush.msra.mxu3 %v525_v14  ;;  %v577_v14 = vld [vmem:[%s3112_s4 + $0x310] sm:$0xff] }
 0x13f   : > { %794 = vmatpush.msra.mxu1 %v485_v8  ;;  %811 = vmatpush.msra.mxu3 %v523_v20  ;;  %v521_v8 = vld [vmem:[%s3112_s4 + $0x150] sm:$0xff] }
 0x140   : > { %v665_v20 = vld [vmem:[%s3112_s4 + $0x5d0] sm:$0xff] }
 0x141   : > { %795 = vmatpush.msra.mxu1 %v483_v33  ;;  %v553_v33 = vld [vmem:[%s3112_s4 + $0x250] sm:$0xff]  ;;  %812 = vmatpush.msra.mxu3 %v521_v8  ;;  %v659_v8 = vld [vmem:[%s3112_s4 + $0x5a0] sm:$0xff] }
 0x142   : > { %832 = vmatpush.msrb.mxu0 %v553_v33  ;;  %v759_v33 = vld [vmem:[%s3112_s4 + $0x8c0] sm:$0xff] }
 0x143   : > { %796 = vmatpush.msra.mxu1 %v481_v34  ;;  %v589_v34 = vld [vmem:[%s3112_s4 + $0x370] sm:$0xff]  ;;  %813 = vmatpush.msra.mxu3 %v519_v40  ;;  %v755_v40 = vld [vmem:[%s3112_s4 + $0x8a0] sm:$0xff] }
 0x144   : > { %850 = vmatpush.msrb.mxu2 %v589_v34  ;;  %833 = vmatpush.msrb.mxu0 %v551_v41  ;;  %v657_v34 = vld [vmem:[%s3112_s4 + $0x590] sm:$0xff] }
 0x145   : > { %797 = vmatpush.msra.mxu1 %v479_v9  ;;  %814 = vmatpush.msra.mxu3 %v517_v47  ;;  %v653_v41 = vld [vmem:[%s3112_s4 + $0x570] sm:$0xff]  ;;  %v719_v47 = vld [vmem:[%s3112_s4 + $0x780] sm:$0xff] }
 0x146   : > { %851 = vmatpush.msrb.mxu2 %v587_v44  ;;  %v753_v44 = vld [vmem:[%s3112_s4 + $0x890] sm:$0xff] }
 0x147   : > { %862 = vmatpush.msrb.mxu1 %v637_v42 }
 0x149   : > { %863 = vmatpush.msrb.mxu1 %v635_v45  ;;  %v619_v45 = vld [vmem:[%s3112_s4 + $0x460] sm:$0xff] }
 0x14b   : > { %864 = vmatpush.msrb.mxu1 %v633_v50 }
 0x14d   : > { %865 = vmatpush.msrb.mxu1 %v631_v56  ;;  %v547_v56 = vld [vmem:[%s3112_s4 + $0x220] sm:$0xff] }
 0x14f   : > { %866 = vmatpush.msrb.mxu1 %v629_v63  ;;  %v513_v63 = vld [vmem:[%s3112_s4 + $0x110] sm:$0xff] }
 0x151   : > { %867 = vmatpush.msrb.mxu1 %v627_v4  ;;  %v511_v4 = vld [vmem:[%s3112_s4 + $0x100] sm:$0xff] }
 0x153   : > { %868 = vmatpush.msrb.mxu1 %v625_v15  ;;  %v609_v15 = vld [vmem:[%s3112_s4 + $0x410] sm:$0xff] }
 0x155   : > { %869 = vmatpush.msrb.mxu1 %v623_v21  ;;  %v697_v21 = vld [vmem:[%s3112_s4 + $0x6d0] sm:$0xff] }
 0x157   : > { %870 = vmatpush.msrb.mxu1 %v621_v38  ;;  %v687_v38 = vld [vmem:[%s3112_s4 + $0x680] sm:$0xff] }
 0x159   : > { %871 = vmatpush.msrb.mxu1 %v619_v45  ;;  %v651_v45 = vld [vmem:[%s3112_s4 + $0x560] sm:$0xff] }
 0x15b   : > { %872 = vmatpush.msrb.mxu1 %v617_v52  ;;  %v749_v52 = vld [vmem:[%s3112_s4 + $0x870] sm:$0xff] }
 0x1a3   : > { %v1907_v25 = vpop.f32.mrf.mxu1 }
 0x1a4   : > { %390 = vrot.lane.b32.xlu0 %v1907_v25, %s1619_s29 }
 0x1ab   : > { %v1922_v29 = vpop.f32.mrf.mxu1 }
 0x1ac   : > { %394 = vrot.lane.b32.xlu2 %v1922_v29, %s1619_s29 }
 0x1af   : > { %v1931_v31 = vpop.f32.mrf.mxu3 }
 0x1b0   : > { %392 = vrot.lane.b32.xlu1 %v1931_v31, %s1619_s29 }
 0x1b7   : > { %v1934_v32 = vpop.f32.mrf.mxu3 }
 0x1b8   : > { %396 = vrot.lane.b32.xlu0 %v1934_v32, %s1619_s29  ;;  %s1624_s29 = smov 108  }
 0x206   : > { %v395_v0 = vpop.permute.xlu2 %394 }
 0x216   : > { %v391_v43 = vpop.permute.xlu0 %390 }
 0x222   : > { %v393_v48 = vpop.permute.xlu1 %392 }
 0x223   : > { %v399_v51 = vsel %vm398_vm10, %v391_v43, %v393_v48  ;;  %v406_v61 = vmax.f32 %v1931_v31, %v393_v48  ;;  %v549_v48 = vld [vmem:[%s3112_s4 + $0x230] sm:$0xff] }
 0x224   : > { %v405_v54 = vmax.f32 %v1907_v25, %v399_v51  ;;  %v585_v51 = vld [vmem:[%s3112_s4 + $0x350] sm:$0xff]  ;;  %834 = vmatpush.msrb.mxu0 %v549_v48  ;;  %v751_v48 = vld [vmem:[%s3112_s4 + $0x880] sm:$0xff] }
 0x225   : > { %v2039_v11 = vmax.f32 %v406_v61, 0.0  ;;  %852 = vmatpush.msrb.mxu2 %v585_v51  ;;  %v615_v61 = vld [vmem:[%s3112_s4 + $0x440] sm:$0xff]  ;;  %v717_v51 = vld [vmem:[%s3112_s4 + $0x770] sm:$0xff] }
 0x226   : > { %v2005_v58 = vmax.f32 %v405_v54, 0.0  ;;  %v515_v54 = vld [vmem:[%s3112_s4 + $0x120] sm:$0xff]  ;;  %835 = vmatpush.msrb.mxu0 %v547_v56  ;;  %873 = vmatpush.msrb.mxu1 %v615_v61  ;;  %v745_v61 = vld [vmem:[%s3112_s4 + $0x850] sm:$0xff] }
 0x227   : > { %v420_v24 = vrot.slane %v2039_v11, 1  ;;  %v435_v26 = vrot.slane %v2039_v11, 2  ;;  %v450_v43 = vrot.slane %v2039_v11, 3  ;;  %v465_v62 = vrot.slane %v2039_v11, 4  ;;  %815 = vmatpush.msra.mxu3 %v515_v54  ;;  %853 = vmatpush.msrb.mxu2 %v583_v60  ;;  %v679_v54 = vld [vmem:[%s3112_s4 + $0x640] sm:$0xff]  ;;  %v713_v60 = vld [vmem:[%s3112_s4 + $0x750] sm:$0xff] }
 0x228   : > { %798 = vmatmul.f32.vlgmr.msra.gmra.mxu1 %v2005_v58  ;;  %v417_v7 = vrot.slane %v2005_v58, 1  ;;  %v447_v42 = vrot.slane %v2005_v58, 3  ;;  %v462_v53 = vrot.slane %v2005_v58, 4  ;;  %v747_v56 = vld [vmem:[%s3112_s4 + $0x860] sm:$0xff] }
 0x229   : > { %816 = vmatpush.msra.mxu3 %v513_v63  ;;  %854 = vmatpush.msrb.mxu2 %v581_v1  ;;  %v675_v63 = vld [vmem:[%s3112_s4 + $0x620] sm:$0xff] }
 0x22a   : > { %v397_v5 = vpop.permute.xlu0 %396  ;;  %874 = vmatpush.msrb.mxu1 %v613_v3  ;;  %v743_v1 = vld [vmem:[%s3112_s4 + $0x840] sm:$0xff]  ;;  %v673_v3 = vld [vmem:[%s3112_s4 + $0x610] sm:$0xff] }
 0x22b   : > { %v408_v12 = vmax.f32 %v1934_v32, %v397_v5  ;;  %v400_v13 = vsel %vm398_vm10, %v395_v0, %v397_v5  ;;  %v545_v0 = vld [vmem:[%s3112_s4 + $0x210] sm:$0xff]  ;;  %v543_v5 = vld [vmem:[%s3112_s4 + $0x200] sm:$0xff]  ;;  %817 = vmatpush.msra.mxu3 %v511_v4  ;;  %855 = vmatpush.msrb.mxu2 %v579_v6 }
 0x22c   : > { %v407_v16 = vmax.f32 %v1922_v29, %v400_v13  ;;  %v432_v29 = vrot.slane %v2005_v58, 2  ;;  %836 = vmatpush.msrb.mxu0 %v545_v0  ;;  %v701_v13 = vld [vmem:[%s3112_s4 + $0x6f0] sm:$0xff]  ;;  %875 = vmatpush.msrb.mxu1 %v611_v10  ;;  %v711_v0 = vld [vmem:[%s3112_s4 + $0x740] sm:$0xff] }
 0x22d   : > { %v2056_v19 = vmax.f32 %v408_v12, 0.0  ;;  %v669_v12 = vld [vmem:[%s3112_s4 + $0x5f0] sm:$0xff]  ;;  %856 = vmatpush.msrb.mxu2 %v577_v14  ;;  %v639_v6 = vld [vmem:[%s3112_s4 + $0x500] sm:$0xff] }
 0x22e   : > { %v411_v22 = vmax.f32 %v407_v16, 0.0  ;;  %837 = vmatpush.msrb.mxu0 %v543_v5  ;;  %v667_v16 = vld [vmem:[%s3112_s4 + $0x5e0] sm:$0xff]  ;;  %882 = vmatpush.msrb.mxu3 %v669_v12  ;;  %v709_v4 = vld [vmem:[%s3112_s4 + $0x730] sm:$0xff] }
 0x22f   : > { %v421_v25 = vrot.slane %v2056_v19, 1  ;;  %v436_v27 = vrot.slane %v2056_v19, 2  ;;  %v451_v37 = vrot.slane %v2056_v19, 3  ;;  %v466_v55 = vrot.slane %v2056_v19, 4  ;;  %v607_v19 = vld [vmem:[%s3112_s4 + $0x400] sm:$0xff]  ;;  %876 = vmatpush.msrb.mxu1 %v609_v15  ;;  %857 = vmatpush.msrb.mxu2 %v575_v18  ;;  %v741_v5 = vld [vmem:[%s3112_s4 + $0x830] sm:$0xff] }
 0x230   : > { %v418_v28 = vrot.slane %v411_v22, 1  ;;  %v433_v30 = vrot.slane %v411_v22, 2  ;;  %v448_v36 = vrot.slane %v411_v22, 3  ;;  %v463_v46 = vrot.slane %v411_v22, 4  ;;  %902 = vmatpush.msra.mxu0 %v701_v13  ;;  %883 = vmatpush.msrb.mxu3 %v667_v16  ;;  %v733_v22 = vld [vmem:[%s3112_s4 + $0x7f0] sm:$0xff]  ;;  %v671_v10 = vld [vmem:[%s3112_s4 + $0x600] sm:$0xff] }
 0x231   : > { %v422_v31 = vsel %vm54_vm1, %v420_v24, %v421_v25  ;;  %v437_v32 = vsel %vm71_vm2, %v435_v26, %v436_v27  ;;  %v452_v50 = vsel %vm88_vm0, %v450_v43, %v451_v37  ;;  %v467_v2 = vsel %vm105_vm3, %v465_v62, %v466_v55  ;;  %877 = vmatpush.msrb.mxu1 %v607_v19  ;;  %v663_v24 = vld [vmem:[%s3112_s4 + $0x5c0] sm:$0xff]  ;;  %v721_v43 = vld [vmem:[%s3112_s4 + $0x790] sm:$0xff] }
 0x232   : > { %425 = vrot.lane.b32.xlu2 %v422_v31, %s1620_s18  ;;  %v419_v9 = vsel %vm54_vm1, %v417_v7, %v418_v28  ;;  %v434_v35 = vsel %vm71_vm2, %v432_v29, %v433_v30  ;;  %v449_v49 = vsel %vm88_vm0, %v447_v42, %v448_v36  ;;  %v464_v57 = vsel %vm105_vm3, %v462_v53, %v463_v46  ;;  %v695_v25 = vld [vmem:[%s3112_s4 + $0x6c0] sm:$0xff]  ;;  %v661_v7 = vld [vmem:[%s3112_s4 + $0x5b0] sm:$0xff] }
 0x233   : > { %423 = vrot.lane.b32.xlu1 %v419_v9, %s1620_s18  ;;  %v1591_v39 = vpack.i.bf16 %v437_v32, %v434_v35  ;;  %v1596_v59 = vpack.i.bf16 %v452_v50, %v449_v49  ;;  %903 = vmatpush.msra.mxu0 %v699_v17  ;;  %v731_v26 = vld [vmem:[%s3112_s4 + $0x7e0] sm:$0xff]  ;;  %v693_v28 = vld [vmem:[%s3112_s4 + $0x6b0] sm:$0xff]  ;;  %vm1151_vm0 = vcmask 56320   ;;  %s1552_s18 = smul.u32 40, %s1267_s16  ;;  %vm1254_vm3 = vcmask 1040384  }
 0x234   : > { %884 = vmatpush.msrb.mxu3 %v665_v20  ;;  %922 = vmatpush.msra.mxu2 %v733_v22  ;;  %v763_v27 = vld [vmem:[%s3112_s4 + $0x8e0] sm:$0xff]  ;;  %v729_v29 = vld [vmem:[%s3112_s4 + $0x7d0] sm:$0xff]  ;;  %v510_v20 = vld [vmem:[%s3112_s4 + $0xf8] sm:$0xff] }
 0x235   : > { %1592 = vrot.lane.b32.xlu0 %v1591_v39, %s1621_s30  ;;  %904 = vmatpush.msra.mxu0 %v697_v21  ;;  %v761_v30 = vld [vmem:[%s3112_s4 + $0x8d0] sm:$0xff]  ;;  %v691_v31 = vld [vmem:[%s3112_s4 + $0x6a0] sm:$0xff]  ;;  %v542_v21 = vld [vmem:[%s3112_s4 + $0x1f8] sm:$0xff] }
 0x236   : > { %1544 = vmatpush.msk.msra.mxu1 %vm71_vm2, %v765_v23  ;;  %885 = vmatpush.msrb.mxu3 %v663_v24  ;;  %v727_v32 = vld [vmem:[%s3112_s4 + $0x7c0] sm:$0xff]  ;;  %v689_v9 = vld [vmem:[%s3112_s4 + $0x690] sm:$0xff] }
 0x237   : > { %905 = vmatpush.msra.mxu0 %v695_v25  ;;  %923 = vmatpush.msra.mxu2 %v731_v26  ;;  %v725_v35 = vld [vmem:[%s3112_s4 + $0x7b0] sm:$0xff]  ;;  %v655_v37 = vld [vmem:[%s3112_s4 + $0x580] sm:$0xff]  ;;  %v508_v25 = vld [vmem:[%s3112_s4 + $0xe8] sm:$0xff] }
 0x238   : > { %943 = vmatpush.msra.mxu1 %v763_v27  ;;  %886 = vmatpush.msrb.mxu3 %v661_v7  ;;  %v757_v36 = vld [vmem:[%s3112_s4 + $0x8b0] sm:$0xff]  ;;  %v723_v39 = vld [vmem:[%s3112_s4 + $0x7a0] sm:$0xff]  ;;  %v540_v26 = vld [vmem:[%s3112_s4 + $0x1e8] sm:$0xff] }
 0x239   : > { %906 = vmatpush.msra.mxu0 %v693_v28  ;;  %924 = vmatpush.msra.mxu2 %v729_v29  ;;  %v685_v42 = vld [vmem:[%s3112_s4 + $0x670] sm:$0xff]  ;;  %v683_v46 = vld [vmem:[%s3112_s4 + $0x660] sm:$0xff]  ;;  %v538_v28 = vld [vmem:[%s3112_s4 + $0x1d8] sm:$0xff] }
 0x23a   : > { %468 = vrot.lane.b32.xlu2 %v464_v57, %s1622_s27  ;;  %944 = vmatpush.msra.mxu1 %v761_v30  ;;  %v649_v49 = vld [vmem:[%s3112_s4 + $0x550] sm:$0xff]  ;;  %v647_v53 = vld [vmem:[%s3112_s4 + $0x540] sm:$0xff] }
 0x23b   : > { %1597 = vrot.lane.b32.xlu1 %v1596_v59, %s1623_s14  ;;  %887 = vmatpush.msrb.mxu3 %v659_v8  ;;  %v681_v50 = vld [vmem:[%s3112_s4 + $0x650] sm:$0xff]  ;;  %v715_v55 = vld [vmem:[%s3112_s4 + $0x760] sm:$0xff]  ;;  %v574_v8 = vld [vmem:[%s3112_s4 + $0x2f8] sm:$0xff] }
 0x23c   : > { %907 = vmatpush.msra.mxu0 %v691_v31  ;;  %925 = vmatpush.msra.mxu2 %v727_v32  ;;  %v645_v57 = vld [vmem:[%s3112_s4 + $0x530] sm:$0xff]  ;;  %v643_v62 = vld [vmem:[%s3112_s4 + $0x520] sm:$0xff]  ;;  %v606_v31 = vld [vmem:[%s3112_s4 + $0x3f8] sm:$0xff] }
 0x23d   : > { %470 = vrot.lane.b32.xlu0 %v467_v2, %s1622_s27  ;;  %945 = vmatpush.msra.mxu1 %v759_v33  ;;  %v677_v59 = vld [vmem:[%s3112_s4 + $0x630] sm:$0xff]  ;;  %v707_v12 = vld [vmem:[%s3112_s4 + $0x720] sm:$0xff]  ;;  %v504_v32 = vld [vmem:[%s3112_s4 + $0xc8] sm:$0xff] }
 0x23e   : > { %888 = vmatpush.msrb.mxu3 %v657_v34  ;;  %908 = vmatpush.msra.mxu0 %v689_v9  ;;  %v641_v2 = vld [vmem:[%s3112_s4 + $0x510] sm:$0xff]  ;;  %v739_v13 = vld [vmem:[%s3112_s4 + $0x820] sm:$0xff]  ;;  %v536_v33 = vld [vmem:[%s3112_s4 + $0x1c8] sm:$0xff] }
 0x23f   : > { %926 = vmatpush.msra.mxu2 %v725_v35  ;;  %946 = vmatpush.msra.mxu1 %v757_v36  ;;  %v705_v14 = vld [vmem:[%s3112_s4 + $0x710] sm:$0xff]  ;;  %v703_v16 = vld [vmem:[%s3112_s4 + $0x700] sm:$0xff]  ;;  %v604_v34 = vld [vmem:[%s3112_s4 + $0x3e8] sm:$0xff] }
 0x240   : > { %889 = vmatpush.msrb.mxu3 %v655_v37  ;;  %909 = vmatpush.msra.mxu0 %v687_v38  ;;  %v737_v15 = vld [vmem:[%s3112_s4 + $0x810] sm:$0xff]  ;;  %v735_v17 = vld [vmem:[%s3112_s4 + $0x800] sm:$0xff]  ;;  %v572_v9 = vld [vmem:[%s3112_s4 + $0x2e8] sm:$0xff] }
 0x241   : > { %927 = vmatpush.msra.mxu2 %v723_v39  ;;  %947 = vmatpush.msra.mxu1 %v755_v40  ;;  %v502_v36 = vld [vmem:[%s3112_s4 + $0xb8] sm:$0xff] }
 0x242   : > { %890 = vmatpush.msrb.mxu3 %v653_v41  ;;  %910 = vmatpush.msra.mxu0 %v685_v42  ;;  %v534_v37 = vld [vmem:[%s3112_s4 + $0x1b8] sm:$0xff] }
 0x243   : > { %928 = vmatpush.msra.mxu2 %v721_v43  ;;  %948 = vmatpush.msra.mxu1 %v753_v44  ;;  %v570_v40 = vld [vmem:[%s3112_s4 + $0x2d8] sm:$0xff]  ;;  %v500_v44 = vld [vmem:[%s3112_s4 + $0xa8] sm:$0xff] }
 0x244   : > { %891 = vmatpush.msrb.mxu3 %v651_v45  ;;  %911 = vmatpush.msra.mxu0 %v683_v46  ;;  %v602_v41 = vld [vmem:[%s3112_s4 + $0x3d8] sm:$0xff]  ;;  %v532_v45 = vld [vmem:[%s3112_s4 + $0x1a8] sm:$0xff] }
 0x245   : > { %929 = vmatpush.msra.mxu2 %v719_v47  ;;  %949 = vmatpush.msra.mxu1 %v751_v48  ;;  %v568_v47 = vld [vmem:[%s3112_s4 + $0x2c8] sm:$0xff] }
 0x246   : > { %892 = vmatpush.msrb.mxu3 %v649_v49  ;;  %912 = vmatpush.msra.mxu0 %v681_v50  ;;  %v600_v48 = vld [vmem:[%s3112_s4 + $0x3c8] sm:$0xff]  ;;  %v498_v50 = vld [vmem:[%s3112_s4 + $0x98] sm:$0xff] }
 0x247   : > { %930 = vmatpush.msra.mxu2 %v717_v51  ;;  %950 = vmatpush.msra.mxu1 %v749_v52  ;;  %v530_v51 = vld [vmem:[%s3112_s4 + $0x198] sm:$0xff] }
 0x248   : > { %893 = vmatpush.msrb.mxu3 %v647_v53  ;;  %913 = vmatpush.msra.mxu0 %v679_v54  ;;  %v566_v54 = vld [vmem:[%s3112_s4 + $0x2b8] sm:$0xff] }
 0x249   : > { %931 = vmatpush.msra.mxu2 %v715_v55  ;;  %951 = vmatpush.msra.mxu1 %v747_v56  ;;  %v598_v55 = vld [vmem:[%s3112_s4 + $0x3b8] sm:$0xff]  ;;  %v496_v56 = vld [vmem:[%s3112_s4 + $0x88] sm:$0xff] }
 0x24a   : > { %894 = vmatpush.msrb.mxu3 %v645_v57  ;;  %914 = vmatpush.msra.mxu0 %v677_v59  ;;  %v528_v57 = vld [vmem:[%s3112_s4 + $0x188] sm:$0xff] }
 0x24b   : > { %932 = vmatpush.msra.mxu2 %v713_v60  ;;  %952 = vmatpush.msra.mxu1 %v745_v61  ;;  %v564_v59 = vld [vmem:[%s3112_s4 + $0x2a8] sm:$0xff]  ;;  %v494_v61 = vld [vmem:[%s3112_s4 + $0x78] sm:$0xff] }
 0x24c   : > { %895 = vmatpush.msrb.mxu3 %v643_v62  ;;  %915 = vmatpush.msra.mxu0 %v675_v63  ;;  %v596_v60 = vld [vmem:[%s3112_s4 + $0x3a8] sm:$0xff]  ;;  %v526_v62 = vld [vmem:[%s3112_s4 + $0x178] sm:$0xff] }
 0x24d   : > { %933 = vmatpush.msra.mxu2 %v711_v0  ;;  %953 = vmatpush.msra.mxu1 %v743_v1  ;;  %v562_v63 = vld [vmem:[%s3112_s4 + $0x298] sm:$0xff]  ;;  %v492_v1 = vld [vmem:[%s3112_s4 + $0x68] sm:$0xff] }
 0x24e   : > { %896 = vmatpush.msrb.mxu3 %v641_v2  ;;  %916 = vmatpush.msra.mxu0 %v673_v3  ;;  %v594_v0 = vld [vmem:[%s3112_s4 + $0x398] sm:$0xff]  ;;  %v524_v2 = vld [vmem:[%s3112_s4 + $0x168] sm:$0xff] }
 0x24f   : > { %934 = vmatpush.msra.mxu2 %v709_v4  ;;  %954 = vmatpush.msra.mxu1 %v741_v5  ;;  %v560_v3 = vld [vmem:[%s3112_s4 + $0x288] sm:$0xff]  ;;  %v490_v5 = vld [vmem:[%s3112_s4 + $0x58] sm:$0xff] }
 0x250   : > { %897 = vmatpush.msrb.mxu3 %v639_v6  ;;  %917 = vmatpush.msra.mxu0 %v671_v10  ;;  %v592_v4 = vld [vmem:[%s3112_s4 + $0x388] sm:$0xff]  ;;  %v522_v6 = vld [vmem:[%s3112_s4 + $0x158] sm:$0xff] }
 0x251   : > { %935 = vmatpush.msra.mxu2 %v707_v12  ;;  %955 = vmatpush.msra.mxu1 %v739_v13  ;;  %v558_v10 = vld [vmem:[%s3112_s4 + $0x278] sm:$0xff]  ;;  %v488_v13 = vld [vmem:[%s3112_s4 + $0x48] sm:$0xff] }
 0x252   : > { %v590_v12 = vld [vmem:[%s3112_s4 + $0x378] sm:$0xff] }
 0x253   : > { %936 = vmatpush.msra.mxu2 %v705_v14  ;;  %956 = vmatpush.msra.mxu1 %v737_v15  ;;  %v520_v14 = vld [vmem:[%s3112_s4 + $0x148] sm:$0xff] }
 0x254   : > { %v556_v15 = vld [vmem:[%s3112_s4 + $0x268] sm:$0xff] }
 0x255   : > { %937 = vmatpush.msra.mxu2 %v703_v16  ;;  %957 = vmatpush.msra.mxu1 %v735_v17  ;;  %v588_v16 = vld [vmem:[%s3112_s4 + $0x368] sm:$0xff]  ;;  %v486_v17 = vld [vmem:[%s3112_s4 + $0x38] sm:$0xff] }
 0x28c   : > { %v426_v18 = vpop.permute.xlu2 %425 }
 0x294   : > { %v469_v49 = vpop.permute.xlu2 %468 }
 0x2a5   : > { %v424_v19 = vpop.permute.xlu1 %423 }
 0x2a6   : > { %v2373_v22 = vsel %vm427_vm11, %v2039_v11, %v424_v19  ;;  %v2375_v23 = vsel %vm427_vm11, %v424_v19, %v426_v18  ;;  %v506_v11 = vld [vmem:[%s3112_s4 + $0xd8] sm:$0xff] }
 0x2a7   : > { %v1593_v24 = vpop.permute.xlu0 %1592  ;;  %818 = vmatmul.f32.vlgmr.msra.gmra.mxu3 %v2373_v22  ;;  %838 = vmatmul.f32.vlgmr.msrb.gmra.mxu0 %v2375_v23  ;;  %v554_v19 = vld [vmem:[%s3112_s4 + $0x258] sm:$0xff] }
 0x2a8   : > { %v1595_v27 = vunpack.i.h.bf16 %v1593_v24  ;;  %v1594_v7 = vunpack.i.l.bf16 %v1593_v24  ;;  %962 = vmatpush.msra.mxu3 %v510_v20  ;;  %982 = vmatpush.msrb.mxu0 %v542_v21  ;;  %v586_v20 = vld [vmem:[%s3112_s4 + $0x358] sm:$0xff]  ;;  %v484_v21 = vld [vmem:[%s3112_s4 + $0x28] sm:$0xff] }
 0x2a9   : > { %v516_v24 = vld [vmem:[%s3112_s4 + $0x128] sm:$0xff] }
 0x2aa   : > { %963 = vmatpush.msra.mxu3 %v508_v25  ;;  %983 = vmatpush.msrb.mxu0 %v540_v26  ;;  %v2391_v29 = vsel %vm442_vm12, %v426_v18, %v1594_v7  ;;  %v2393_v30 = vsel %vm442_vm12, %v1594_v7, %v1595_v27  ;;  %v518_v18 = vld [vmem:[%s3112_s4 + $0x138] sm:$0xff]  ;;  %v552_v25 = vld [vmem:[%s3112_s4 + $0x248] sm:$0xff] }
 0x2ab   : > { %858 = vmatmul.f32.vlgmr.msrb.gmra.mxu2 %v2391_v29  ;;  %878 = vmatmul.f32.vlgmr.msrb.gmra.mxu1 %v2393_v30  ;;  %v584_v26 = vld [vmem:[%s3112_s4 + $0x348] sm:$0xff]  ;;  %v514_v7 = vld [vmem:[%s3112_s4 + $0x118] sm:$0xff] }
 0x2ac   : > { %964 = vmatpush.msra.mxu3 %v506_v11  ;;  %984 = vmatpush.msrb.mxu0 %v538_v28  ;;  %v550_v11 = vld [vmem:[%s3112_s4 + $0x238] sm:$0xff] }
 0x2ad   : > { %1002 = vmatpush.msrb.mxu2 %v574_v8  ;;  %1022 = vmatpush.msrb.mxu1 %v606_v31  ;;  %v1598_v35 = vpop.permute.xlu1 %1597  ;;  %v582_v28 = vld [vmem:[%s3112_s4 + $0x338] sm:$0xff]  ;;  %v480_v8 = vld [vmem:[%s3112_s4 + $0x8] sm:$0xff] }
 0x2ae   : > { %965 = vmatpush.msra.mxu3 %v504_v32  ;;  %v1600_v38 = vunpack.i.h.bf16 %v1598_v35  ;;  %v1599_v39 = vunpack.i.l.bf16 %v1598_v35  ;;  %985 = vmatpush.msrb.mxu0 %v536_v33  ;;  %v512_v31 = vld [vmem:[%s3112_s4 + $0x108] sm:$0xff]  ;;  %v546_v35 = vld [vmem:[%s3112_s4 + $0x218] sm:$0xff] }
 0x2af   : > { %1023 = vmatpush.msrb.mxu1 %v604_v34  ;;  %1003 = vmatpush.msrb.mxu2 %v572_v9  ;;  %v471_v46 = vpop.permute.xlu0 %470  ;;  %v548_v32 = vld [vmem:[%s3112_s4 + $0x228] sm:$0xff]  ;;  %v638_v34 = vld [vmem:[%s3112_s4 + $0x4f8] sm:$0xff] }
 0x2b0   : > { %966 = vmatpush.msra.mxu3 %v502_v36  ;;  %986 = vmatpush.msrb.mxu0 %v534_v37  ;;  %v2428_v42 = vsel %vm457_vm13, %v1595_v27, %v1599_v39  ;;  %v2431_v43 = vsel %vm457_vm13, %v1599_v39, %v1600_v38  ;;  %v2454_v52 = vsel %vm472_vm14, %v469_v49, %v471_v46  ;;  %v482_v27 = vld [vmem:[%s3112_s4 + $0x18] sm:$0xff]  ;;  %v580_v33 = vld [vmem:[%s3112_s4 + $0x328] sm:$0xff] }
 0x2b1   : > { %1004 = vmatpush.msrb.mxu2 %v570_v40  ;;  %1024 = vmatpush.msrb.mxu1 %v602_v41  ;;  %v2457_v53 = vsel %vm472_vm14, %v1600_v38, %v469_v49  ;;  %v670_v9 = vld [vmem:[%s3112_s4 + $0x5f8] sm:$0xff]  ;;  %v636_v37 = vld [vmem:[%s3112_s4 + $0x4e8] sm:$0xff] }
 0x2b2   : > { %898 = vmatmul.f32.vlgmr.msrb.gmra.mxu3 %v2428_v42  ;;  %918 = vmatmul.f32.vlgmr.msra.gmra.mxu0 %v2431_v43  ;;  %v578_v36 = vld [vmem:[%s3112_s4 + $0x318] sm:$0xff]  ;;  %v668_v38 = vld [vmem:[%s3112_s4 + $0x5e8] sm:$0xff] }
 0x2b3   : > { %967 = vmatpush.msra.mxu3 %v500_v44  ;;  %987 = vmatpush.msrb.mxu0 %v532_v45  ;;  %v544_v39 = vld [vmem:[%s3112_s4 + $0x208] sm:$0xff]  ;;  %v666_v40 = vld [vmem:[%s3112_s4 + $0x5d8] sm:$0xff] }
 0x2b4   : > { %1005 = vmatpush.msrb.mxu2 %v568_v47  ;;  %1025 = vmatpush.msrb.mxu1 %v600_v48  ;;  %v702_v41 = vld [vmem:[%s3112_s4 + $0x6f8] sm:$0xff]  ;;  %v632_v45 = vld [vmem:[%s3112_s4 + $0x4c8] sm:$0xff] }
 0x2b5   : > { %938 = vmatmul.f32.vlgmr.msra.gmra.mxu2 %v2457_v53  ;;  %1545 = vmatmul.msk.f32.vlgmr.msra.gmra.mxu1 %vm773_vm15, %v2454_v52  ;;  %v734_v44 = vld [vmem:[%s3112_s4 + $0x7f8] sm:$0xff]  ;;  %v664_v46 = vld [vmem:[%s3112_s4 + $0x5c8] sm:$0xff] }
 0x2b6   : > { %968 = vmatpush.msra.mxu3 %v498_v50  ;;  %988 = vmatpush.msrb.mxu0 %v530_v51  ;;  %v700_v47 = vld [vmem:[%s3112_s4 + $0x6e8] sm:$0xff]  ;;  %v662_v48 = vld [vmem:[%s3112_s4 + $0x5b8] sm:$0xff] }
 0x2b7   : > { %1006 = vmatpush.msrb.mxu2 %v566_v54  ;;  %1026 = vmatpush.msrb.mxu1 %v598_v55  ;;  %v698_v49 = vld [vmem:[%s3112_s4 + $0x6d8] sm:$0xff]  ;;  %v628_v51 = vld [vmem:[%s3112_s4 + $0x4a8] sm:$0xff] }
 0x2b8   : > { %969 = vmatpush.msra.mxu3 %v496_v56  ;;  %989 = vmatpush.msrb.mxu0 %v528_v57  ;;  %v730_v50 = vld [vmem:[%s3112_s4 + $0x7d8] sm:$0xff]  ;;  %v660_v54 = vld [vmem:[%s3112_s4 + $0x5a8] sm:$0xff] }
 0x2b9   : > { %1007 = vmatpush.msrb.mxu2 %v564_v59  ;;  %1027 = vmatpush.msrb.mxu1 %v596_v60  ;;  %v696_v55 = vld [vmem:[%s3112_s4 + $0x6c8] sm:$0xff]  ;;  %v626_v57 = vld [vmem:[%s3112_s4 + $0x498] sm:$0xff] }
 0x2ba   : > { %970 = vmatpush.msra.mxu3 %v494_v61  ;;  %990 = vmatpush.msrb.mxu0 %v526_v62  ;;  %v728_v56 = vld [vmem:[%s3112_s4 + $0x7c8] sm:$0xff]  ;;  %v658_v59 = vld [vmem:[%s3112_s4 + $0x598] sm:$0xff] }
 0x2bb   : > { %1008 = vmatpush.msrb.mxu2 %v562_v63  ;;  %1028 = vmatpush.msrb.mxu1 %v594_v0  ;;  %v694_v60 = vld [vmem:[%s3112_s4 + $0x6b8] sm:$0xff]  ;;  %v624_v62 = vld [vmem:[%s3112_s4 + $0x488] sm:$0xff] }
 0x2bc   : > { %971 = vmatpush.msra.mxu3 %v492_v1  ;;  %991 = vmatpush.msrb.mxu0 %v524_v2  ;;  %v726_v61 = vld [vmem:[%s3112_s4 + $0x7b8] sm:$0xff]  ;;  %v656_v63 = vld [vmem:[%s3112_s4 + $0x588] sm:$0xff] }
 0x2bd   : > { %1009 = vmatpush.msrb.mxu2 %v560_v3  ;;  %1029 = vmatpush.msrb.mxu1 %v592_v4  ;;  %v692_v0 = vld [vmem:[%s3112_s4 + $0x6a8] sm:$0xff]  ;;  %v622_v2 = vld [vmem:[%s3112_s4 + $0x478] sm:$0xff] }
 0x2be   : > { %972 = vmatpush.msra.mxu3 %v490_v5  ;;  %992 = vmatpush.msrb.mxu0 %v522_v6  ;;  %v724_v1 = vld [vmem:[%s3112_s4 + $0x7a8] sm:$0xff]  ;;  %v654_v3 = vld [vmem:[%s3112_s4 + $0x578] sm:$0xff] }
 0x2bf   : > { %1010 = vmatpush.msrb.mxu2 %v558_v10  ;;  %1030 = vmatpush.msrb.mxu1 %v590_v12  ;;  %v690_v4 = vld [vmem:[%s3112_s4 + $0x698] sm:$0xff]  ;;  %v620_v6 = vld [vmem:[%s3112_s4 + $0x468] sm:$0xff] }
 0x2c0   : > { %973 = vmatpush.msra.mxu3 %v488_v13  ;;  %993 = vmatpush.msrb.mxu0 %v520_v14  ;;  %v722_v5 = vld [vmem:[%s3112_s4 + $0x798] sm:$0xff]  ;;  %v652_v10 = vld [vmem:[%s3112_s4 + $0x568] sm:$0xff] }
 0x2c1   : > { %1011 = vmatpush.msrb.mxu2 %v556_v15  ;;  %1031 = vmatpush.msrb.mxu1 %v588_v16  ;;  %v688_v12 = vld [vmem:[%s3112_s4 + $0x688] sm:$0xff]  ;;  %v618_v14 = vld [vmem:[%s3112_s4 + $0x458] sm:$0xff] }
 0x2c2   : > { %974 = vmatpush.msra.mxu3 %v486_v17  ;;  %994 = vmatpush.msrb.mxu0 %v518_v18  ;;  %v720_v13 = vld [vmem:[%s3112_s4 + $0x788] sm:$0xff]  ;;  %v650_v15 = vld [vmem:[%s3112_s4 + $0x558] sm:$0xff] }
 0x2c3   : > { %1012 = vmatpush.msrb.mxu2 %v554_v19  ;;  %1032 = vmatpush.msrb.mxu1 %v586_v20  ;;  %v686_v16 = vld [vmem:[%s3112_s4 + $0x678] sm:$0xff]  ;;  %v616_v18 = vld [vmem:[%s3112_s4 + $0x448] sm:$0xff] }
 0x2c4   : > { %975 = vmatpush.msra.mxu3 %v484_v21  ;;  %995 = vmatpush.msrb.mxu0 %v516_v24  ;;  %v718_v17 = vld [vmem:[%s3112_s4 + $0x778] sm:$0xff]  ;;  %v648_v19 = vld [vmem:[%s3112_s4 + $0x548] sm:$0xff] }
 0x2c5   : > { %1013 = vmatpush.msrb.mxu2 %v552_v25  ;;  %1033 = vmatpush.msrb.mxu1 %v584_v26  ;;  %v684_v20 = vld [vmem:[%s3112_s4 + $0x668] sm:$0xff]  ;;  %v614_v24 = vld [vmem:[%s3112_s4 + $0x438] sm:$0xff] }
 0x2c6   : > { %976 = vmatpush.msra.mxu3 %v482_v27  ;;  %996 = vmatpush.msrb.mxu0 %v514_v7  ;;  %v716_v21 = vld [vmem:[%s3112_s4 + $0x768] sm:$0xff]  ;;  %v646_v25 = vld [vmem:[%s3112_s4 + $0x538] sm:$0xff] }
 0x2c7   : > { %1014 = vmatpush.msrb.mxu2 %v550_v11  ;;  %1034 = vmatpush.msrb.mxu1 %v582_v28  ;;  %v682_v26 = vld [vmem:[%s3112_s4 + $0x658] sm:$0xff]  ;;  %v612_v7 = vld [vmem:[%s3112_s4 + $0x428] sm:$0xff] }
 0x2c8   : > { %977 = vmatpush.msra.mxu3 %v480_v8  ;;  %997 = vmatpush.msrb.mxu0 %v512_v31  ;;  %v714_v27 = vld [vmem:[%s3112_s4 + $0x758] sm:$0xff]  ;;  %v644_v11 = vld [vmem:[%s3112_s4 + $0x528] sm:$0xff] }
 0x2c9   : > { %1015 = vmatpush.msrb.mxu2 %v548_v32  ;;  %1035 = vmatpush.msrb.mxu1 %v580_v33  ;;  %v680_v28 = vld [vmem:[%s3112_s4 + $0x648] sm:$0xff]  ;;  %v610_v31 = vld [vmem:[%s3112_s4 + $0x418] sm:$0xff] }
 0x2ca   : > { %978 = vmatmul.f32.vlgmr.msra.gmra.mxu3 %v2005_v58  ;;  %998 = vmatmul.f32.vlgmr.msrb.gmra.mxu0 %v2373_v22  ;;  %v576_v58 = vld [vmem:[%s3112_s4 + $0x308] sm:$0xff]  ;;  %v634_v22 = vld [vmem:[%s3112_s4 + $0x4d8] sm:$0xff] }
 0x2cb   : > { %1042 = vmatpush.msrb.mxu3 %v638_v34  ;;  %1062 = vmatpush.msra.mxu0 %v670_v9  ;;  %v712_v8 = vld [vmem:[%s3112_s4 + $0x748] sm:$0xff]  ;;  %v642_v32 = vld [vmem:[%s3112_s4 + $0x518] sm:$0xff] }
 0x2cc   : > { %1016 = vmatpush.msrb.mxu2 %v546_v35  ;;  %1036 = vmatpush.msrb.mxu1 %v578_v36  ;;  %v678_v33 = vld [vmem:[%s3112_s4 + $0x638] sm:$0xff]  ;;  %v608_v9 = vld [vmem:[%s3112_s4 + $0x408] sm:$0xff] }
 0x2cd   : > { %1043 = vmatpush.msrb.mxu3 %v636_v37  ;;  %1063 = vmatpush.msra.mxu0 %v668_v38  ;;  %v710_v34 = vld [vmem:[%s3112_s4 + $0x738] sm:$0xff]  ;;  %v640_v35 = vld [vmem:[%s3112_s4 + $0x508] sm:$0xff] }
 0x2ce   : > { %1017 = vmatpush.msrb.mxu2 %v544_v39  ;;  %1037 = vmatpush.msrb.mxu1 %v576_v58  ;;  %v676_v36 = vld [vmem:[%s3112_s4 + $0x628] sm:$0xff]  ;;  %v766_v38 = vld [vmem:[%s3112_s4 + $0x8f8] sm:$0x3f] }
 0x2cf   : > { %1018 = vmatmul.f32.vlgmr.msrb.gmra.mxu2 %v2375_v23  ;;  %1038 = vmatmul.f32.vlgmr.msrb.gmra.mxu1 %v2391_v29  ;;  %v732_v23 = vld [vmem:[%s3112_s4 + $0x7e8] sm:$0xff]  ;;  %v630_v29 = vld [vmem:[%s3112_s4 + $0x4b8] sm:$0xff] }
 0x2d0   : > { %1044 = vmatpush.msrb.mxu3 %v634_v22  ;;  %1064 = vmatpush.msra.mxu0 %v666_v40  ;;  %v708_v37 = vld [vmem:[%s3112_s4 + $0x728] sm:$0xff]  ;;  %v674_v39 = vld [vmem:[%s3112_s4 + $0x618] sm:$0xff] }
 0x2d1   : > { %1082 = vmatpush.msra.mxu2 %v702_v41  ;;  %1102 = vmatpush.msra.mxu1 %v734_v44  ;;  %v706_v58 = vld [vmem:[%s3112_s4 + $0x718] sm:$0xff]  ;;  %v764_v22 = vld [vmem:[%s3112_s4 + $0x8e8] sm:$0xff] }
 0x2d2   : > { %1045 = vmatpush.msrb.mxu3 %v632_v45  ;;  %1065 = vmatpush.msra.mxu0 %v664_v46  ;;  %v672_v40 = vld [vmem:[%s3112_s4 + $0x608] sm:$0xff]  ;;  %v758_v44 = vld [vmem:[%s3112_s4 + $0x8b8] sm:$0xff] }
 0x2d3   : > { %1083 = vmatpush.msra.mxu2 %v700_v47  ;;  %1103 = vmatpush.msra.mxu1 %v732_v23  ;;  %v704_v41 = vld [vmem:[%s3112_s4 + $0x708] sm:$0xff]  ;;  %v750_v46 = vld [vmem:[%s3112_s4 + $0x878] sm:$0xff] }
 0x2d4   : > { %1046 = vmatpush.msrb.mxu3 %v630_v29  ;;  %1066 = vmatpush.msra.mxu0 %v662_v48  ;;  %v756_v45 = vld [vmem:[%s3112_s4 + $0x8a8] sm:$0xff]  ;;  %v746_v23 = vld [vmem:[%s3112_s4 + $0x858] sm:$0xff] }
 0x2d5   : > { %1084 = vmatpush.msra.mxu2 %v698_v49  ;;  %1104 = vmatpush.msra.mxu1 %v730_v50  ;;  %v748_v47 = vld [vmem:[%s3112_s4 + $0x868] sm:$0xff]  ;;  %v742_v48 = vld [vmem:[%s3112_s4 + $0x838] sm:$0xff] }
 0x2d6   : > { %1047 = vmatpush.msrb.mxu3 %v628_v51  ;;  %1067 = vmatpush.msra.mxu0 %v660_v54  ;;  %v744_v29 = vld [vmem:[%s3112_s4 + $0x848] sm:$0xff]  ;;  %v738_v50 = vld [vmem:[%s3112_s4 + $0x818] sm:$0xff]  ;;  %v767_v54 = vld [vmem:[%s3113_s5] sm:$0x3] }
 0x2d7   : > { %1085 = vmatpush.msra.mxu2 %v696_v55  ;;  %1105 = vmatpush.msra.mxu1 %v728_v56  ;;  %v740_v49 = vld [vmem:[%s3112_s4 + $0x828] sm:$0xff]  ;;  %v769_v55 = vperm.slane %v767_v54, 0  ;;  %v799_v56 = vpop.f32.mrf.mxu1 }
 0x2d8   : > { %1048 = vmatpush.msrb.mxu3 %v626_v57  ;;  %1068 = vmatpush.msra.mxu0 %v658_v59  ;;  %v736_v51 = vld [vmem:[%s3112_s4 + $0x808] sm:$0xff] }
 0x2d9   : > { %1086 = vmatpush.msra.mxu2 %v694_v60  ;;  %1106 = vmatpush.msra.mxu1 %v726_v61  ;;  %v800_v57 = vadd.f32 %v799_v56, %v769_v55 }
 0x2da   : > { %1049 = vmatpush.msrb.mxu3 %v624_v62  ;;  %1069 = vmatpush.msra.mxu0 %v656_v63 }
 0x2db   : > { %1087 = vmatpush.msra.mxu2 %v692_v0  ;;  %1107 = vmatpush.msra.mxu1 %v724_v1 }
 0x2dc   : > { %1050 = vmatpush.msrb.mxu3 %v622_v2  ;;  %1070 = vmatpush.msra.mxu0 %v654_v3 }
 0x2dd   : > { %1088 = vmatpush.msra.mxu2 %v690_v4  ;;  %1108 = vmatpush.msra.mxu1 %v722_v5 }
 0x2de   : > { %1051 = vmatpush.msrb.mxu3 %v620_v6  ;;  %1071 = vmatpush.msra.mxu0 %v652_v10 }
 0x2df   : > { %1089 = vmatpush.msra.mxu2 %v688_v12  ;;  %1109 = vmatpush.msra.mxu1 %v720_v13 }
 0x2e0   : > { %1052 = vmatpush.msrb.mxu3 %v618_v14  ;;  %1072 = vmatpush.msra.mxu0 %v650_v15 }
 0x2e1   : > { %1090 = vmatpush.msra.mxu2 %v686_v16  ;;  %1110 = vmatpush.msra.mxu1 %v718_v17  ;;  %v1150_v16 = vld [vmem:[%s3114_s6] sm:$0xf]  ;;  %v770_v17 = vperm.slane %v767_v54, 1 }
 0x2e2   : > { %1053 = vmatpush.msrb.mxu3 %v616_v18  ;;  %1073 = vmatpush.msra.mxu0 %v648_v19 }
 0x2e3   : > { %1091 = vmatpush.msra.mxu2 %v684_v20  ;;  %1111 = vmatpush.msra.mxu1 %v716_v21 }
 0x2e4   : > { %1054 = vmatpush.msrb.mxu3 %v614_v24  ;;  %1074 = vmatpush.msra.mxu0 %v646_v25 }
 0x2e5   : > { %1092 = vmatpush.msra.mxu2 %v682_v26  ;;  %1112 = vmatpush.msra.mxu1 %v714_v27 }
 0x2e6   : > { %1055 = vmatpush.msrb.mxu3 %v612_v7  ;;  %1075 = vmatpush.msra.mxu0 %v644_v11 }
 0x2e7   : > { %1093 = vmatpush.msra.mxu2 %v680_v28  ;;  %1113 = vmatpush.msra.mxu1 %v712_v8 }
 0x2e8   : > { %1056 = vmatpush.msrb.mxu3 %v610_v31  ;;  %1076 = vmatpush.msra.mxu0 %v642_v32 }
 0x2e9   : > { %1094 = vmatpush.msra.mxu2 %v678_v33  ;;  %1114 = vmatpush.msra.mxu1 %v710_v34 }
 0x2ea   : > { %1057 = vmatpush.msrb.mxu3 %v608_v9  ;;  %1077 = vmatpush.msra.mxu0 %v640_v35 }
 0x2eb   : > { %1095 = vmatpush.msra.mxu2 %v676_v36  ;;  %1115 = vmatpush.msra.mxu1 %v708_v37 }
 0x2ec   : > { %1058 = vmatmul.f32.vlgmr.msrb.gmra.mxu3 %v2393_v30  ;;  %1078 = vmatmul.f32.vlgmr.msra.gmra.mxu0 %v2428_v42  ;;  %v762_v30 = vld [vmem:[%s3112_s4 + $0x8d8] sm:$0xff]  ;;  %v760_v42 = vld [vmem:[%s3112_s4 + $0x8c8] sm:$0xff] }
 0x2ed   : > { %1546 = vmatpush.msk.msra.mxu3 %vm71_vm2, %v766_v38  ;;  %1096 = vmatpush.msra.mxu2 %v674_v39  ;;  %vm1207_vm2 = vcmask 883712  }
 0x2ee   : > { %1116 = vmatpush.msra.mxu1 %v706_v58 }
 0x2ef   : > { %1123 = vmatpush.msra.mxu3 %v764_v22  ;;  %1097 = vmatpush.msra.mxu2 %v672_v40 }
 0x2f0   : > { %1117 = vmatpush.msra.mxu1 %v704_v41  ;;  %1098 = vmatmul.f32.vlgmr.msra.gmra.mxu2 %v2431_v43  ;;  %v754_v43 = vld [vmem:[%s3112_s4 + $0x898] sm:$0xff] }
 0x2f1   : > { %1118 = vmatmul.f32.vlgmr.msra.gmra.mxu1 %v2457_v53  ;;  %1124 = vmatpush.msra.mxu3 %v762_v30  ;;  %v752_v53 = vld [vmem:[%s3112_s4 + $0x888] sm:$0xff] }
 0x2f3   : > { %1125 = vmatpush.msra.mxu3 %v760_v42 }
 0x2f5   : > { %1126 = vmatpush.msra.mxu3 %v758_v44 }
 0x2f7   : > { %1127 = vmatpush.msra.mxu3 %v756_v45 }
 0x2f9   : > { %1128 = vmatpush.msra.mxu3 %v754_v43 }
 0x2fb   : > { %1129 = vmatpush.msra.mxu3 %v752_v53 }
 0x2fd   : > { %1130 = vmatpush.msra.mxu3 %v750_v46 }
 0x2ff   : > { %1131 = vmatpush.msra.mxu3 %v748_v47 }
 0x301   : > { %1132 = vmatpush.msra.mxu3 %v746_v23 }
 0x303   : > { %1133 = vmatpush.msra.mxu3 %v744_v29 }
 0x305   : > { %1134 = vmatpush.msra.mxu3 %v742_v48 }
 0x307   : > { %1135 = vmatpush.msra.mxu3 %v740_v49 }
 0x309   : > { %1136 = vmatpush.msra.mxu3 %v738_v50 }
 0x30b   : > { %1137 = vmatpush.msra.mxu3 %v736_v51 }
 0x30c   : > { %1547 = vmatmul.msk.f32.vlgmr.msra.gmra.mxu3 %vm773_vm15, %v2454_v52 }
 0x324   : > { %v839_v61 = vpop.f32.mrf.mxu0 }
 0x328   : > { %v879_v1 = vpop.f32.mrf.mxu1 }
 0x32a   : > { %v819_v59 = vpop.f32.mrf.mxu3 }
 0x32b   : > { %v820_v60 = vadd.f32 %v819_v59, %v800_v57 }
 0x32d   : > { %v840_v62 = vadd.f32 %v839_v61, %v820_v60  ;;  %v1263_v60 = vlaneseq }
 0x32e   : > { %v859_v63 = vpop.f32.mrf.mxu2 }
 0x32f   : > { %v860_v0 = vadd.f32 %v859_v63, %v840_v62  ;;  %v919_v5 = vpop.f32.mrf.mxu0  ;;  %vm1265_vm7 = vcmp.lt.s32.totalorder %v1263_v60, 560  ;;  %v1301_v60 = vld [vmem:[%s3115_s7 + $0x98] sm:$0xff] (%p40_p0) }
 0x331   : > { %v880_v2 = vadd.f32 %v879_v1, %v860_v0 }
 0x332   : > { %v959_v12 = vpop.f32.mrf.mxu1 }
 0x335   : > { %v899_v3 = vpop.f32.mrf.mxu3 }
 0x336   : > { %v900_v4 = vadd.f32 %v899_v3, %v880_v2 }
 0x338   : > { %v920_v6 = vadd.f32 %v919_v5, %v900_v4  ;;  %v939_v52 = vpop.f32.mrf.mxu2 }
 0x33a   : > { %v940_v10 = vadd.f32 %v939_v52, %v920_v6  ;;  %v1297_v52 = vld [vmem:[%s3115_s7 + $0x78] sm:$0xff] (%p40_p0) }
 0x33c   : > { %v960_v13 = vadd.f32 %v959_v12, %v940_v10  ;;  %v1329_v10 = vld [vmem:[%s3115_s7 + $0x178] sm:$0xff] (%p40_p0)  ;;  %v1296_v12 = vld [vmem:[%s3115_s7 + $0x70] sm:$0xff] (%p40_p0) }
 0x33e   : > { %v1144_v14 = vrot.slane %v960_v13, 1 }
 0x340   : > { %v1148_v15 = vmax.f32 %v960_v13, %v1144_v14  ;;  %v1328_v13 = vld [vmem:[%s3115_s7 + $0x170] sm:$0xff] (%p40_p0)  ;;  %v1345_v14 = vld [vmem:[%s3115_s7 + $0x1f8] sm:$0xff] (%p40_p0) }
 0x341   :  { %1420 = vmatpush.msra.mxu3 (%p40_p0), %v1345_v14  ;;  %v1298_v14 = vld [vmem:[%s3115_s7 + $0x80] sm:$0xff] (%p40_p0) }
 0x342   : > { %1548 = vmatpush.msk.msrb.mxu0 %vm54_vm1, %v1148_v15  ;;  %v1295_v15 = vld [vmem:[%s3115_s7 + $0x68] sm:$0xff] (%p40_p0) }
 0x343   : > { %1549 = vmatmul.msk.f32.vlgmr.msrb.gmra.mxu0 %vm1151_vm0, %v1150_v16 }
 0x344   :  { %1360 = vmatpush.msra.mxu0 (%p40_p0), %v1297_v52  ;;  %v1330_v52 = vld [vmem:[%s3115_s7 + $0x180] sm:$0xff] (%p40_p0) }
 0x346   :  { %1361 = vmatpush.msra.mxu0 (%p40_p0), %v1296_v12 }
 0x347   : > { %v999_v20 = vpop.f32.mrf.mxu0 }
 0x348   :  { %1362 = vmatpush.msra.mxu0 (%p40_p0), %v1295_v15  ;;  %v1349_v15 = vld [vmem:[%s3115_s7 + $0x218] sm:$0xff] (%p40_p0) }
 0x34c   : > { %v1039_v26 = vpop.f32.mrf.mxu1 }
 0x34d   : > { %v979_v18 = vpop.f32.mrf.mxu3 }
 0x34e   : > { %v980_v19 = vadd.f32 %v979_v18, %v770_v17  ;;  %v1327_v17 = vld [vmem:[%s3115_s7 + $0x168] sm:$0xff] (%p40_p0)  ;;  %v1344_v18 = vld [vmem:[%s3115_s7 + $0x1f0] sm:$0xff] (%p40_p0) }
 0x34f   :  { %1421 = vmatpush.msra.mxu3 (%p40_p0), %v1344_v18  ;;  %v1347_v18 = vld [vmem:[%s3115_s7 + $0x208] sm:$0xff] (%p40_p0) }
 0x350   : > { %v1000_v21 = vadd.f32 %v999_v20, %v980_v19  ;;  %v1312_v19 = vld [vmem:[%s3115_s7 + $0xf0] sm:$0xff] (%p40_p0)  ;;  %v1294_v20 = vld [vmem:[%s3115_s7 + $0x60] sm:$0xff] (%p40_p0) }
 0x351   :  { %1363 = vmatpush.msra.mxu0 (%p40_p0), %v1294_v20 }
 0x352   : > { %v1019_v24 = vpop.f32.mrf.mxu2 }
 0x353   : > { %v1020_v25 = vadd.f32 %v1019_v24, %v1000_v21  ;;  %v1326_v21 = vld [vmem:[%s3115_s7 + $0x160] sm:$0xff] (%p40_p0)  ;;  %v1343_v24 = vld [vmem:[%s3115_s7 + $0x1e8] sm:$0xff] (%p40_p0) }
 0x354   :  { %1422 = vmatpush.msra.mxu3 (%p40_p0), %v1343_v24  ;;  %v1466_v24 = vld [vmem:[%s3117_s9 + $0x28] sm:$0xff] (%p40_p0) }
 0x355   : > { %v1040_v7 = vadd.f32 %v1039_v26, %v1020_v25  ;;  %v1311_v25 = vld [vmem:[%s3115_s7 + $0xe8] sm:$0xff] (%p40_p0)  ;;  %v1342_v26 = vld [vmem:[%s3115_s7 + $0x1e0] sm:$0xff] (%p40_p0) }
 0x356   :  { %1423 = vmatpush.msra.mxu3 (%p40_p0), %v1342_v26  ;;  %v1464_v26 = vld [vmem:[%s3117_s9 + $0x18] sm:$0xff] (%p40_p0) }
 0x369   : > { %v1079_v28 = vpop.f32.mrf.mxu0 }
 0x36e   : > { %v1119_v33 = vpop.f32.mrf.mxu1 }
 0x36f   : > { %v1059_v27 = vpop.f32.mrf.mxu3 }
 0x370   : > { %v1060_v11 = vadd.f32 %v1059_v27, %v1040_v7  ;;  %v1293_v27 = vld [vmem:[%s3115_s7 + $0x58] sm:$0xff] (%p40_p0) }
 0x371   :  { %v1325_v7 = vld [vmem:[%s3115_s7 + $0x158] sm:$0xff] (%p40_p0)  ;;  %1364 = vmatpush.msra.mxu0 (%p40_p0), %v1293_v27  ;;  %v1463_v27 = vld [vmem:[%s3117_s9 + $0x10] sm:$0xff] (%p40_p0) }
 0x372   : > { %v1080_v8 = vadd.f32 %v1079_v28, %v1060_v11  ;;  %v1310_v11 = vld [vmem:[%s3115_s7 + $0xe0] sm:$0xff] (%p40_p0)  ;;  %v1341_v28 = vld [vmem:[%s3115_s7 + $0x1d8] sm:$0xff] (%p40_p0) }
 0x373   : > { %v1099_v31 = vpop.f32.mrf.mxu2  ;;  %1424 = vmatpush.msra.mxu3 (%p40_p0), %v1341_v28  ;;  %v1601_v28 = vld [vmem:[%s3116_s8] ss:$0 sm:$0xff] (%p40_p0) }
 0x374   : > { %v1100_v32 = vadd.f32 %v1099_v31, %v1080_v8  ;;  %v1292_v8 = vld [vmem:[%s3115_s7 + $0x50] sm:$0xff] (%p40_p0) }
 0x375   :  { %v1324_v31 = vld [vmem:[%s3115_s7 + $0x150] sm:$0xff] (%p40_p0)  ;;  %1365 = vmatpush.msra.mxu0 (%p40_p0), %v1292_v8 }
 0x376   : > { %v1120_v34 = vadd.f32 %v1119_v33, %v1100_v32  ;;  %v1309_v32 = vld [vmem:[%s3115_s7 + $0xd8] sm:$0xff] (%p40_p0)  ;;  %v1340_v33 = vld [vmem:[%s3115_s7 + $0x1d0] sm:$0xff] (%p40_p0) }
 0x377   :  { %1425 = vmatpush.msra.mxu3 (%p40_p0), %v1340_v33 }
 0x38f   : > { %v1139_v9 = vpop.f32.mrf.mxu3 }
 0x390   : > { %v1140_v35 = vadd.f32 %v1139_v9, %v1120_v34  ;;  %v1291_v34 = vld [vmem:[%s3115_s7 + $0x48] sm:$0xff] (%p40_p0) }
 0x391   :  { %v1323_v9 = vld [vmem:[%s3115_s7 + $0x148] sm:$0xff] (%p40_p0)  ;;  %1366 = vmatpush.msra.mxu0 (%p40_p0), %v1291_v34 }
 0x392   : > { %v1145_v36 = vrot.slane %v1140_v35, 1 }
 0x394   : > { %v1149_v37 = vmax.f32 %v1140_v35, %v1145_v36  ;;  %v1308_v35 = vld [vmem:[%s3115_s7 + $0xd0] sm:$0xff] (%p40_p0)  ;;  %v1339_v36 = vld [vmem:[%s3115_s7 + $0x1c8] sm:$0xff] (%p40_p0) }
 0x395   :  { %1426 = vmatpush.msra.mxu3 (%p40_p0), %v1339_v36 }
 0x396   : > { %1550 = vmatpush.msk.msrb.mxu2 %vm54_vm1, %v1149_v37  ;;  %vm1241_vm1 = vcmask 293888   ;;  %v1290_v37 = vld [vmem:[%s3115_s7 + $0x40] sm:$0xff] (%p40_p0) }
 0x397   : > { %1551 = vmatmul.msk.f32.vlgmr.msrb.gmra.mxu2 %vm1151_vm0, %v1150_v16  ;;  %v1313_v16 = vld [vmem:[%s3115_s7 + $0xf8] sm:$0xff] (%p40_p0)  ;;  %1367 = vmatpush.msra.mxu0 (%p40_p0), %v1290_v37 }
 0x398   :  { %1400 = vmatpush.msra.mxu2 (%p40_p0), %v1329_v10  ;;  %1380 = vmatpush.msra.mxu1 (%p40_p0), %v1313_v16  ;;  %v1350_v10 = vld [vmem:[%s3115_s7 + $0x220] sm:$0xff] (%p40_p0) }
 0x39a   :  { %1401 = vmatpush.msra.mxu2 (%p40_p0), %v1328_v13  ;;  %1381 = vmatpush.msra.mxu1 (%p40_p0), %v1312_v19  ;;  %v1346_v19 = vld [vmem:[%s3115_s7 + $0x200] sm:$0xff] (%p40_p0) }
 0x39c   :  { %1402 = vmatpush.msra.mxu2 (%p40_p0), %v1327_v17  ;;  %1382 = vmatpush.msra.mxu1 (%p40_p0), %v1311_v25  ;;  %v1348_v17 = vld [vmem:[%s3115_s7 + $0x210] sm:$0xff] (%p40_p0)  ;;  %v1465_v25 = vld [vmem:[%s3117_s9 + $0x20] sm:$0xff] (%p40_p0) }
 0x39e   :  { %1403 = vmatpush.msra.mxu2 (%p40_p0), %v1326_v21  ;;  %1383 = vmatpush.msra.mxu1 (%p40_p0), %v1310_v11  ;;  %v1467_v21 = vld [vmem:[%s3117_s9 + $0x30] sm:$0x3] (%p40_p0)  ;;  %v1461_v11 = vld [vmem:[%s3117_s9] sm:$0xff] (%p40_p0) }
 0x3a0   :  { %1404 = vmatpush.msra.mxu2 (%p40_p0), %v1325_v7  ;;  %1384 = vmatpush.msra.mxu1 (%p40_p0), %v1309_v32  ;;  %v1462_v7 = vld [vmem:[%s3117_s9 + $0x8] sm:$0xff] (%p40_p0) }
 0x3a2   :  { %1405 = vmatpush.msra.mxu2 (%p40_p0), %v1324_v31  ;;  %1385 = vmatpush.msra.mxu1 (%p40_p0), %v1308_v35 }
 0x3a4   :  { %1406 = vmatpush.msra.mxu2 (%p40_p0), %v1323_v9 }
 0x3c0   : > { %v1178_v38 = vpop.f32.mrf.mxu0 }
 0x3c1   : > { %1203 = vrot.lane.b32.xlu1 %v1178_v38, %s1624_s29 }
 0x41a   : > { %v1198_v39 = vpop.f32.mrf.mxu2 }
 0x41b   : > { %1205 = vrot.lane.b32.xlu2 %v1198_v39, %s1624_s29 }
 0x433   : > { %v1204_v58 = vpop.permute.xlu1 %1203 }
 0x475   : > { %v1206_v22 = vpop.permute.xlu2 %1205 }
 0x476   : > { %v1212_v40 = vmax.f32 %v1198_v39, %v1206_v22  ;;  %v1208_v41 = vsel %vm1207_vm2, %v1204_v58, %v1206_v22  ;;  %v1307_v39 = vld [vmem:[%s3115_s7 + $0xc8] sm:$0xff] (%p40_p0)  ;;  %v1338_v58 = vld [vmem:[%s3115_s7 + $0x1c0] sm:$0xff] (%p40_p0)  ;;  %v1289_v22 = vld [vmem:[%s3115_s7 + $0x38] sm:$0xff] (%p40_p0) }
 0x477   : > { %v1211_v30 = vmax.f32 %v1178_v38, %v1208_v41  ;;  %v1322_v38 = vld [vmem:[%s3115_s7 + $0x140] sm:$0xff] (%p40_p0)  ;;  %1386 = vmatpush.msra.mxu1 (%p40_p0), %v1307_v39  ;;  %1427 = vmatpush.msra.mxu3 (%p40_p0), %v1338_v58 }
 0x478   : > { %v1214_v42 = vmax.f32 %v1212_v40, 0.0  ;;  %v1321_v40 = vld [vmem:[%s3115_s7 + $0x138] sm:$0xff] (%p40_p0)  ;;  %1407 = vmatpush.msra.mxu2 (%p40_p0), %v1322_v38  ;;  %v1306_v41 = vld [vmem:[%s3115_s7 + $0xc0] sm:$0xff] (%p40_p0)  ;;  %1368 = vmatpush.msra.mxu0 (%p40_p0), %v1289_v22 }
 0x479   : > { %v1213_v44 = vmax.f32 %v1211_v30, 0.0  ;;  %v1337_v30 = vld [vmem:[%s3115_s7 + $0x1b8] sm:$0xff] (%p40_p0)  ;;  %1387 = vmatpush.msra.mxu1 (%p40_p0), %v1306_v41  ;;  %v1602_v58 = vld [vmem:[%s3118_s10] ss:$0 sm:$0xff] (%p40_p0) }
 0x47a   : > { %v1218_v45 = vrot.slane %v1214_v42, 1  ;;  %v1236_v47 = vrot.slane %v1214_v42, 3  ;;  %v1227_v23 = vrot.slane %v1214_v42, 2  ;;  %1408 = vmatpush.msra.mxu2 (%p40_p0), %v1321_v40  ;;  %1428 = vmatpush.msra.mxu3 (%p40_p0), %v1337_v30 }
 0x47b   : > { %v1226_v43 = vrot.slane %v1213_v44, 2  ;;  %v1217_v53 = vrot.slane %v1213_v44, 1  ;;  %v1235_v46 = vrot.slane %v1213_v44, 3 }
 0x47c   : > { %1221 = vrot.lane.b32.xlu1 %v1218_v45, %s1625_s15  ;;  %v1305_v45 = vld [vmem:[%s3115_s7 + $0xb8] sm:$0xff] (%p40_p0) }
 0x47d   : > { %1228 = vrot.lane.b32.xlu2 %v1226_v43, %s1622_s27  ;;  %1219 = vrot.lane.b32.xlu0 %v1217_v53, %s1625_s15  ;;  %v1336_v43 = vld [vmem:[%s3115_s7 + $0x1b0] sm:$0xff] (%p40_p0)  ;;  %v1287_v53 = vld [vmem:[%s3115_s7 + $0x28] sm:$0xff] (%p40_p0) }
 0x47e   :  { %1388 = vmatpush.msra.mxu1 (%p40_p0), %v1305_v45  ;;  %1429 = vmatpush.msra.mxu3 (%p40_p0), %v1336_v43 }
 0x484   : > { %1237 = vrot.lane.b32.xlu1 %v1235_v46, %s1626_s28  ;;  %v1319_v46 = vld [vmem:[%s3115_s7 + $0x128] sm:$0xff] (%p40_p0) }
 0x485   : > { %1239 = vrot.lane.b32.xlu2 %v1236_v47, %s1626_s28  ;;  %1230 = vrot.lane.b32.xlu0 %v1227_v23, %s1622_s27  ;;  %s1273_s27 = sadd.s32 %s1552_s18, %s1270_s19  ;;  %v1304_v47 = vld [vmem:[%s3115_s7 + $0xb0] sm:$0xff] (%p40_p0)  ;;  %v1335_v23 = vld [vmem:[%s3115_s7 + $0x1a8] sm:$0xff] (%p40_p0) }
 0x486   : > { %s1274_s20 = scalar_lea.vmem [#allocation2], %s1273_s27  ;;  %1389 = vmatpush.msra.mxu1 (%p40_p0), %v1304_v47  ;;  %1430 = vmatpush.msra.mxu3 (%p40_p0), %v1335_v23 }
 0x4d7   : > { %v1229_v29 = vpop.permute.xlu2 %1228 }
 0x4df   : > { %v1240_v56 = vpop.permute.xlu2 %1239 }
 0x4ee   : > { %v1222_v48 = vpop.permute.xlu1 %1221 }
 0x4ef   : > { %v1220_v49 = vpop.permute.xlu0 %1219 }
 0x4f0   : > { %v1223_v50 = vsel %vm180_vm4, %v1220_v49, %v1222_v48  ;;  %v1244_v51 = vsel %vm180_vm4, %v1214_v42, %v1220_v49  ;;  %vm1258_vm4 = vcmask 1043459   ;;  %v1288_v42 = vld [vmem:[%s3115_s7 + $0x30] sm:$0xff] (%p40_p0)  ;;  %v1318_v48 = vld [vmem:[%s3115_s7 + $0x120] sm:$0xff] (%p40_p0)  ;;  %v1303_v49 = vld [vmem:[%s3115_s7 + $0xa8] sm:$0xff] (%p40_p0) }
 0x4f1   : > { %v1245_v54 = vsel %vm472_vm14, %v1223_v50, %v1229_v29  ;;  %v1250_v55 = vrot.slane %v1244_v51, 7  ;;  %1369 = vmatpush.msra.mxu0 (%p40_p0), %v1288_v42  ;;  %v1334_v50 = vld [vmem:[%s3115_s7 + $0x1a0] sm:$0xff] (%p40_p0)  ;;  %v1285_v51 = vld [vmem:[%s3115_s7 + $0x18] sm:$0xff] (%p40_p0)  ;;  %1390 = vmatpush.msra.mxu1 (%p40_p0), %v1303_v49 }
 0x4f2   : > { %v1251_v62 = vrot.slane %v1245_v54, 6  ;;  %v1317_v54 = vld [vmem:[%s3115_s7 + $0x118] sm:$0xff] (%p40_p0)  ;;  %1431 = vmatpush.msra.mxu3 (%p40_p0), %v1334_v50 }
 0x4f3   : > { %v1255_v0 = vsel %vm1254_vm3, %v1213_v44, %v1250_v55  ;;  %v1320_v44 = vld [vmem:[%s3115_s7 + $0x130] sm:$0xff] (%p40_p0)  ;;  %1370 = vmatpush.msra.mxu0 (%p40_p0), %v1287_v53  ;;  %v1302_v55 = vld [vmem:[%s3115_s7 + $0xa0] sm:$0xff] (%p40_p0) }
 0x4f4   : > { %v1257_v4 = vsel %vm1256_vm5, %v1255_v0, %v1251_v62  ;;  %1409 = vmatpush.msra.mxu2 (%p40_p0), %v1320_v44  ;;  %1391 = vmatpush.msra.mxu1 (%p40_p0), %v1302_v55  ;;  %v1283_v62 = vld [vmem:[%s3115_s7 + $0x8] sm:$0xff] (%p40_p0)  ;;  %v1300_v0 = vld [vmem:[%s3115_s7 + $0x90] sm:$0xff] (%p40_p0) }
 0x4f6   : > { %v1238_v57 = vpop.permute.xlu1 %1237  ;;  %1410 = vmatpush.msra.mxu2 (%p40_p0), %v1319_v46  ;;  %1392 = vmatpush.msra.mxu1 (%p40_p0), %v1301_v60 }
 0x4f7   : > { %v1242_v59 = vsel %vm1241_vm1, %v1238_v57, %v1240_v56  ;;  %v1231_v61 = vpop.permute.xlu0 %1230  ;;  %v1333_v56 = vld [vmem:[%s3115_s7 + $0x198] sm:$0xff] (%p40_p0) }
 0x4f8   : > { %v1232_v63 = vsel %vm472_vm14, %v1229_v29, %v1231_v61  ;;  %v1253_v2 = vrot.slane %v1242_v59, 4  ;;  %v1286_v29 = vld [vmem:[%s3115_s7 + $0x20] sm:$0xff] (%p40_p0)  ;;  %1411 = vmatpush.msra.mxu2 (%p40_p0), %v1318_v48  ;;  %v1316_v59 = vld [vmem:[%s3115_s7 + $0x110] sm:$0xff] (%p40_p0)  ;;  %1432 = vmatpush.msra.mxu3 (%p40_p0), %v1333_v56 }
 0x4f9   : > { %v1246_v1 = vsel %vm1241_vm1, %v1232_v63, %v1238_v57  ;;  %1371 = vmatpush.msra.mxu0 (%p40_p0), %v1286_v29  ;;  %v1284_v57 = vld [vmem:[%s3115_s7 + $0x10] sm:$0xff] (%p40_p0)  ;;  %v1315_v63 = vld [vmem:[%s3115_s7 + $0x108] sm:$0xff] (%p40_p0)  ;;  %1393 = vmatpush.msra.mxu1 (%p40_p0), %v1300_v0 }
 0x4fa   : > { %v1252_v3 = vrot.slane %v1246_v1, 5  ;;  %1412 = vmatpush.msra.mxu2 (%p40_p0), %v1317_v54  ;;  %v1332_v61 = vld [vmem:[%s3115_s7 + $0x190] sm:$0xff] (%p40_p0)  ;;  %v1331_v1 = vld [vmem:[%s3115_s7 + $0x188] sm:$0xff] (%p40_p0) }
 0x4fb   :  { %42 = sbr.rel (!%p40_p0) target bundleno = 1 (0x1), region = 73  ;;  %1372 = vmatpush.msra.mxu0 (%p40_p0), %v1285_v51  ;;  %1433 = vmatpush.msra.mxu3 (%p40_p0), %v1332_v61 }
 0x4fc   : > { %v1259_v5 = vsel %vm1258_vm4, %v1252_v3, %v1253_v2  ;;  %1413 = vmatpush.msra.mxu2 (%p40_p0), %v1316_v59  ;;  %v1282_v2 = vld [vmem:[%s3115_s7] sm:$0xff] (%p40_p0) }
 0x4fd   : > { %v1261_v6 = vsel %vm1260_vm6, %v1257_v4, %v1259_v5  ;;  %1373 = vmatpush.msra.mxu0 (%p40_p0), %v1284_v57  ;;  %v1314_v3 = vld [vmem:[%s3115_s7 + $0x100] sm:$0xff] (%p40_p0)  ;;  %v1351_v4 = vld [vmem:[%s3115_s7 + $0x228] sm:$0xff] (%p40_p0)  ;;  %1434 = vmatpush.msra.mxu3 (%p40_p0), %v1331_v1 }
 0x4fe   : > { %1275 = vst.msk [vmem:[%s1274_s20] ss:$8 sm:$0xf] %vm1265_vm7, %v1261_v6  ;;  %1414 = vmatpush.msra.mxu2 (%p40_p0), %v1315_v63 }
 0x4ff   : > { %1276 = vst.msk [vmem:[%s1274_s20] ss:$8 sm:$0x10] %vm1265_vm7, %v1261_v6  ;;  %1374 = vmatpush.msra.mxu0 (%p40_p0), %v1283_v62  ;;  %v1299_v6 = vld [vmem:[%s3115_s7 + $0x88] sm:$0xff] (%p40_p0)  ;;  %1435 = vmatpush.msra.mxu3 (%p40_p0), %v1330_v52 }
 0x500   :  { %1415 = vmatpush.msra.mxu2 %v1314_v3  ;;  %1394 = vmatpush.msra.mxu1 %v1299_v6 }
 0x501   :  { %1375 = vmatpush.msra.mxu0 %v1282_v2 }
 0x502   :  { %1395 = vmatpush.msra.mxu1 %v1298_v14 }
 0x503   :  { %1450 = vmatpush.msrb.mxu0 %v1351_v4 }
 0x504   :  { %1554 = vmatpush.msk.msrb.mxu1 %vm1256_vm5, %v1467_v21 }
 0x505   :  { %1451 = vmatpush.msrb.mxu0 %v1350_v10 }
 0x506   :  { %v1279_v5 = vld [vmem:[#allocation2 + $0x10] sm:$0xff]  ;;  %v1280_v12 = vld [vmem:[#allocation2 + $0x18] sm:$0xff]  ;;  %v1277_v13 = vld [vmem:[#allocation2] sm:$0xff]  ;;  %1490 = vmatpush.msrb.mxu1 %v1466_v24 }
 0x507   :  { %1416 = vmatmul.f32.vlgmr.msra.gmra.mxu2 %v1279_v5  ;;  %v1278_v16 = vld [vmem:[#allocation2 + $0x8] sm:$0xff]  ;;  %1436 = vmatmul.f32.vlgmr.msra.gmra.mxu3 %v1280_v12  ;;  %v1281_v20 = vld [vmem:[#allocation2 + $0x20] sm:$0xff] }
 0x508   :  { %1376 = vmatmul.f32.vlgmr.msra.gmra.mxu0 %v1277_v13  ;;  %1396 = vmatmul.f32.vlgmr.msra.gmra.mxu1 %v1278_v16 }
 0x509   :  { %1452 = vmatpush.msrb.mxu0 %v1349_v15  ;;  %1491 = vmatpush.msrb.mxu1 %v1465_v25 }
 0x50b   :  { %1453 = vmatpush.msrb.mxu0 %v1348_v17  ;;  %1492 = vmatpush.msrb.mxu1 %v1464_v26 }
 0x50d   :  { %1454 = vmatpush.msrb.mxu0 %v1347_v18  ;;  %1493 = vmatpush.msrb.mxu1 %v1463_v27 }
 0x50f   :  { %1455 = vmatpush.msrb.mxu0 %v1346_v19  ;;  %1494 = vmatpush.msrb.mxu1 %v1462_v7 }
 0x510   :  { %1553 = vmatmul.msk.f32.vlgmr.msrb.gmra.mxu0 %vm1356_vm8, %v1281_v20 }
 0x511   :  { %1495 = vmatpush.msrb.mxu1 %v1461_v11 }
 0x585   :  { %v1377_v8 = vpop.f32.mrf.mxu0  ;;  %v1397_v32 = vpop.f32.mrf.mxu1 }
 0x586   :  { %v1378_v31 = vadd.f32 %v1601_v28, %v1377_v8 }
 0x588   :  { %v1398_v33 = vadd.f32 %v1397_v32, %v1378_v31 }
 0x58a   :  { %v1417_v34 = vpop.f32.mrf.mxu2  ;;  %v1437_v35 = vpop.f32.mrf.mxu3 }
 0x58b   :  { %v1418_v9 = vadd.f32 %v1417_v34, %v1398_v33 }
 0x58d   :  { %v1438_v36 = vadd.f32 %v1437_v35, %v1418_v9  ;;  %v1457_v37 = vpop.f32.mrf.mxu0 }
 0x58f   :  { %v1458_v38 = vadd.f32 %v1457_v37, %v1438_v36 }
 0x591   :  { %v1460_v39 = vmax.f32 %v1458_v38, 0.0 }
 0x593   :  { %1555 = vmatmul.msk.f32.vlgmr.msrb.gmra.mxu1 %vm457_vm13, %v1460_v39 }
 0x610   :  { %v1497_v22 = vpop.f32.mrf.mxu1 }
 0x611   :  { %v1498_v40 = vadd.f32 %v1602_v58, %v1497_v22 }
 0x613   :  { %v1501_v41 = vsel %vm1500_vm9, %v1498_v40, -inf }
 0x614   :  { %1502 = vmax.xlane.f32.xlu0 %v1501_v41 }
 0x687   :  { %v1503_v30 = vpop.xlane.xlu0 %1502 }
 0x688   :  { %v1504_v42 = vsub.f32 %v1498_v40, %v1503_v30 }
 0x68a   :  { %v1505_v44 = vmul.f32 1.442695, %v1504_v42 }
 0x68c   :  { %1603 = vpow2.f32 %v1505_v44 }
 0x692   :  { %v1604_v45 = vpop.eup %1603 }
 0x693   :  { %v1507_v43 = vsel %vm1500_vm9, %v1604_v45, 0.0 }
 0x694   :  { %1508 = vadd.xlane.f32.xlu0 %v1507_v43 }
 0x707   :  { %v1509_v53 = vpop.xlane.xlu0 %1508 }
 0x708   :  { %1605 = vlog2.f32 %v1509_v53 }
 0x70e   :  { %v1606_v46 = vpop.eup %1605 }
 0x70f   :  { %v1511_v47 = vmul.f32 0.6931472, %v1606_v46 }
 0x711   :  { %v1512_v23 = vadd.f32 %v1511_v47, %v1503_v30 }
 0x713   :  { %v1513_v29 = vsub.f32 %v1498_v40, %v1512_v23 }
 0x715   :  { %1514 = vst.msk [vmem:[%s3119_s11] sm:$0xff] %vm1500_vm9, %v1513_v29 }

</bundles_post_ra>
